<compile_context>
chip_gen: v7x
topology: tpu7x:2x2x1
jax: 0.10.0
libtpu: 0.0.40
codegen_flags: <defaults>
</compile_context>

<pallas_src>
import math

import jax
import jax.numpy as jnp
from jax.experimental import pallas as pl
from jax.experimental.pallas import tpu as pltpu

# ---- model hyper-parameters (small, consistent with the module) -------------
BATCH = 2
SEQ = 8
HIDDEN = 32
HEADS = 2
HEAD_DIM = HIDDEN // HEADS
FF = HIDDEN * 4
NUM_BLOCKS = 2
MAX_SEQ = 16
INIT_RANGE = 0.02
LN_EPS = 1e-6
NEG_INF = -1e12


# =============================================================================
# Pallas kernel: full SASRec forward (all blocks, all heads, all batch rows)
# in a single grid=() invocation.  Weight refs carry a leading NUM_BLOCKS axis
# (and a head axis for attention weights); all matmul weights are [in, out].
# =============================================================================
def _sasrec_fused_kernel(x_ref, mask_ref,
                         wqkv_ref,   # (L, 3, H, D, Dh)   q-weights pre-scaled by 1/sqrt(Dh)
                         wo_ref,     # (L, H, Dh, D)
                         w1_ref,     # (L, D, FF)
                         b1_ref,     # (L, 1, FF)
                         w2_ref,     # (L, FF, D)
                         vec_ref,    # (L, 3, 1, D)  [0]=ln_w [1]=ln_b [2]=b2
                         out_ref):
    # (B, S, D) -> (B*S, D): leading-dim collapse, layout-cheap.
    x = x_ref[...].reshape(BATCH * SEQ, HIDDEN)
    # Hoisted once per call: boolean attend-mask (True = attend).
    keep = mask_ref[...] > 0.5                                   # (B, S, S) bool

    for l in range(NUM_BLOCKS):                                  # static block loop
        # ---------------- multi-head self attention ----------------
        attn = jnp.zeros((BATCH * SEQ, HIDDEN), jnp.float32)
        for h in range(HEADS):                                   # static head loop
            # Per-head projections via leading-axis ref indexing (no lane slices).
            qh = jnp.dot(x, wqkv_ref[l, 0, h],
                         preferred_element_type=jnp.float32)     # (BS, Dh), scale folded in
            kh = jnp.dot(x, wqkv_ref[l, 1, h],
                         preferred_element_type=jnp.float32)
            vh = jnp.dot(x, wqkv_ref[l, 2, h],
                         preferred_element_type=jnp.float32)
            qh3 = qh.reshape(BATCH, SEQ, HEAD_DIM)
            kh3 = kh.reshape(BATCH, SEQ, HEAD_DIM)
            vh3 = vh.reshape(BATCH, SEQ, HEAD_DIM)

            # Batched QK^T without an explicit transpose (contract last dims).
            s = jnp.einsum('bqd,bkd->bqk', qh3, kh3,
                           preferred_element_type=jnp.float32)   # (B, S, S)
            s = jnp.where(keep, s, NEG_INF)                      # faithful masked_fill
            s = s - jnp.max(s, axis=-1, keepdims=True)
            p = jnp.exp(s)
            p = p / jnp.sum(p, axis=-1, keepdims=True)           # exact softmax denom
            oh = jnp.einsum('bqk,bkd->bqd', p, vh3,
                            preferred_element_type=jnp.float32)  # (B, S, Dh)

            # Accumulate through the per-head Wo block (no lane concatenate).
            attn = attn + jnp.dot(oh.reshape(BATCH * SEQ, HEAD_DIM), wo_ref[l, h],
                                  preferred_element_type=jnp.float32)

        out = attn + x                                           # dropout = identity (eval)

        # LayerNorm(hidden, eps=1e-6)
        mu = jnp.mean(out, axis=-1, keepdims=True)
        var = jnp.mean((out - mu) ** 2, axis=-1, keepdims=True)
        out = (out - mu) * jax.lax.rsqrt(var + LN_EPS)
        out = out * vec_ref[l, 0] + vec_ref[l, 1]

        # ---------------- point-wise feed forward ----------------
        residual = out
        h1 = jnp.dot(out, w1_ref[l], preferred_element_type=jnp.float32) + b1_ref[l]
        h1 = h1 * 0.5 * (1.0 + jax.lax.erf(h1 * (1.0 / math.sqrt(2.0))))  # exact (erf) GELU
        h2 = jnp.dot(h1, w2_ref[l], preferred_element_type=jnp.float32) + vec_ref[l, 2]
        x = h2 + residual                                        # no LN after FFN (reference quirk)

    out_ref[...] = x.reshape(BATCH, SEQ, HIDDEN)


def sasrec_fused(x, mask, packed):
    num_inputs = 8

    # Rough advisory cost hint (per launch).
    flops_per_block = (3 * HEADS * 2 * BATCH * SEQ * HIDDEN * HEAD_DIM      # QKV
                       + HEADS * 2 * (2 * BATCH * SEQ * SEQ * HEAD_DIM)     # QK^T + PV
                       + HEADS * 2 * BATCH * SEQ * HEAD_DIM * HIDDEN        # Wo accum
                       + 2 * 2 * BATCH * SEQ * HIDDEN * FF)                 # FFN
    transc_per_block = BATCH * HEADS * SEQ * SEQ + BATCH * SEQ * FF + BATCH * SEQ
    weight_floats = (NUM_BLOCKS * (3 * HIDDEN * HIDDEN + HIDDEN * HIDDEN
                                   + 2 * HIDDEN * FF + FF + 3 * HIDDEN))
    bytes_accessed = 4 * (2 * BATCH * SEQ * HIDDEN + BATCH * SEQ * SEQ + weight_floats)

    return pl.pallas_call(
        _sasrec_fused_kernel,
        out_shape=jax.ShapeDtypeStruct((BATCH, SEQ, HIDDEN), jnp.float32),
        in_specs=[pl.BlockSpec(memory_space=pltpu.MemorySpace.VMEM)] * num_inputs,
        out_specs=pl.BlockSpec(memory_space=pltpu.MemorySpace.VMEM),
        cost_estimate=pl.CostEstimate(
            flops=NUM_BLOCKS * flops_per_block,
            transcendentals=NUM_BLOCKS * transc_per_block,
            bytes_accessed=bytes_accessed),
    )(x, mask,
      packed["wqkv"], packed["wo"],
      packed["w1"], packed["b1"], packed["w2"], packed["vec"])


# =============================================================================
# Plain-JAX glue: positional encoding table, mask construction, param init.
# =============================================================================
def positional_encoding_table(d_model, max_len):
    position = jnp.arange(max_len, dtype=jnp.float32)[:, None]
    div_term = jnp.exp(jnp.arange(0, d_model, 2, dtype=jnp.float32)
                       * (-math.log(10000.0) / d_model))
    pe = jnp.zeros((max_len, d_model), dtype=jnp.float32)
    pe = pe.at[:, 0::2].set(jnp.sin(position * div_term))
    pe = pe.at[:, 1::2].set(jnp.cos(position * div_term))
    return pe


def init_params(key):
    def normal(k, shape):
        return (INIT_RANGE * jax.random.normal(k, shape)).astype(jnp.float32)

    def split_cols(w_io, scale=1.0):
        # (D, D) [in, out] -> (H, D, Dh): head h reads output cols [h*Dh:(h+1)*Dh]
        return jnp.stack([scale * w_io[:, h * HEAD_DIM:(h + 1) * HEAD_DIM]
                          for h in range(HEADS)])

    def split_rows(w_io):
        # (D, D) [in, out] -> (H, Dh, D): head h feeds input rows [h*Dh:(h+1)*Dh]
        return jnp.stack([w_io[h * HEAD_DIM:(h + 1) * HEAD_DIM, :]
                          for h in range(HEADS)])

    inv_sqrt_dk = 1.0 / math.sqrt(HEAD_DIM)   # folded into Wq (exact: power of two)

    wqkv, wo, w1, b1, w2, vec = [], [], [], [], [], []
    for _ in range(NUM_BLOCKS):
        key, *ks = jax.random.split(key, 7)
        # Drawn in nn.Linear convention [out, in]; transposed once to [in, out]
        # and pre-split per head so the kernel never lane-slices activations.
        wq_io = normal(ks[0], (HIDDEN, HIDDEN)).T
        wk_io = normal(ks[1], (HIDDEN, HIDDEN)).T
        wv_io = normal(ks[2], (HIDDEN, HIDDEN)).T
        wo_io = normal(ks[3], (HIDDEN, HIDDEN)).T
        wqkv.append(jnp.stack([split_cols(wq_io, inv_sqrt_dk),
                               split_cols(wk_io),
                               split_cols(wv_io)]))              # (3, H, D, Dh)
        wo.append(split_rows(wo_io))                             # (H, Dh, D)
        w1.append(normal(ks[4], (FF, HIDDEN)).T)                 # (D, FF)
        b1.append(jnp.zeros((1, FF), jnp.float32))
        w2.append(normal(ks[5], (HIDDEN, FF)).T)                 # (FF, D)
        vec.append(jnp.stack([jnp.ones((1, HIDDEN), jnp.float32),    # ln_w
                              jnp.zeros((1, HIDDEN), jnp.float32),   # ln_b
                              jnp.zeros((1, HIDDEN), jnp.float32)]))  # b2

    packed = {
        "wqkv": jnp.stack(wqkv),   # (L, 3, H, D, Dh)
        "wo":   jnp.stack(wo),     # (L, H, Dh, D)
        "w1":   jnp.stack(w1),     # (L, D, FF)
        "b1":   jnp.stack(b1),     # (L, 1, FF)
        "w2":   jnp.stack(w2),     # (L, FF, D)
        "vec":  jnp.stack(vec),    # (L, 3, 1, D)
    }
    return {"pe": positional_encoding_table(HIDDEN, MAX_SEQ), "packed": packed}


def sasrec_forward(input_seq, mask_ids, params):
    B, S, D = input_seq.shape
    pe = params["pe"][:S]
    # `seqs += self.positional_encoding(seqs)`  =>  seqs = x + (x + pe) = 2x + pe
    seqs = input_seq + (input_seq + pe[None, :, :])

    # make_pad_mask & make_subsequent_mask -> combined (B, S, S) mask
    valid = (mask_ids != 0)
    pad_mask = valid[:, :, None] & valid[:, None, :]
    causal = jnp.tril(jnp.ones((S, S), dtype=bool))      # triu(diag=1) == 0
    full_mask = (pad_mask & causal[None]).astype(jnp.float32)

    return sasrec_fused(seqs, full_mask, params["packed"])


if __name__ == "__main__":
    key = jax.random.PRNGKey(0)
    k_in, k_mask, k_par = jax.random.split(key, 3)

    input_seq = jax.random.normal(k_in, (BATCH, SEQ, HIDDEN), dtype=jnp.float32)
    # integer "item id" sequence used only for mask construction; 0 = padding
    mask_ids = jax.random.randint(k_mask, (BATCH, SEQ), 0, 5, dtype=jnp.int32)
    mask_ids = mask_ids.at[0, SEQ - 2:].set(0)  # ensure some padding exists

    params = init_params(k_par)

    out = sasrec_forward(input_seq, mask_ids, params)
    jax.block_until_ready(out)
    assert out.shape == (BATCH, SEQ, HIDDEN)
    print("KERNEL_OK")
</pallas_src>

<mosaic_0001>
module attributes {stable_mosaic.version = 11 : i64} {
  func.func @_sasrec_fused_kernel(%arg0: memref<2x8x32xf32, #tpu.memory_space<vmem>>, %arg1: memref<2x8x8xf32, #tpu.memory_space<vmem>>, %arg2: memref<2x3x2x32x16xf32, #tpu.memory_space<vmem>>, %arg3: memref<2x2x16x32xf32, #tpu.memory_space<vmem>>, %arg4: memref<2x32x128xf32, #tpu.memory_space<vmem>>, %arg5: memref<2x1x128xf32, #tpu.memory_space<vmem>>, %arg6: memref<2x128x32xf32, #tpu.memory_space<vmem>>, %arg7: memref<2x3x1x32xf32, #tpu.memory_space<vmem>>, %arg8: memref<2x8x32xf32, #tpu.memory_space<vmem>>) attributes {dimension_semantics = [], scalar_prefetch = 0 : i64, scratch_operands = 0 : i64, tpu.core_type = #tpu.core_type<tc>} {
    %c0 = arith.constant 0 : index
    %c0_0 = arith.constant 0 : index
    %c0_1 = arith.constant 0 : index
    %0 = vector.load %arg0[%c0, %c0_0, %c0_1] : memref<2x8x32xf32, #tpu.memory_space<vmem>>, vector<2x8x32xf32>
    %1 = vector.shape_cast %0 : vector<2x8x32xf32> to vector<16x32xf32>
    %c0_2 = arith.constant 0 : index
    %c0_3 = arith.constant 0 : index
    %c0_4 = arith.constant 0 : index
    %2 = vector.load %arg1[%c0_2, %c0_3, %c0_4] : memref<2x8x8xf32, #tpu.memory_space<vmem>>, vector<2x8x8xf32>
    %cst = arith.constant 5.000000e-01 : f32
    %3 = vector.broadcast %cst : f32 to vector<2x8x8xf32>
    %4 = arith.cmpf ogt, %2, %3 : vector<2x8x8xf32>
    %cst_5 = arith.constant 0.000000e+00 : f32
    %5 = vector.broadcast %cst_5 : f32 to vector<16x32xf32>
    %c0_6 = arith.constant 0 : index
    %c0_7 = arith.constant 0 : index
    %c0_8 = arith.constant 0 : index
    %c0_9 = arith.constant 0 : index
    %c0_10 = arith.constant 0 : index
    %6 = vector.load %arg2[%c0_6, %c0_7, %c0_8, %c0_9, %c0_10] : memref<2x3x2x32x16xf32, #tpu.memory_space<vmem>>, vector<1x1x1x32x16xf32>
    %7 = vector.shape_cast %6 : vector<1x1x1x32x16xf32> to vector<32x16xf32>
    %cst_11 = arith.constant dense<0.000000e+00> : vector<16x16xf32>
    %8 = tpu.matmul %1, %7, %cst_11 {dimension_numbers = #tpu.dot_dimension_numbers<[1], [0], [0], [1], [0, 0, 1, 1], [], []>} : vector<16x32xf32>, vector<32x16xf32>, vector<16x16xf32> -> vector<16x16xf32>
    %c0_12 = arith.constant 0 : index
    %c1 = arith.constant 1 : index
    %c0_13 = arith.constant 0 : index
    %c0_14 = arith.constant 0 : index
    %c0_15 = arith.constant 0 : index
    %9 = vector.load %arg2[%c0_12, %c1, %c0_13, %c0_14, %c0_15] : memref<2x3x2x32x16xf32, #tpu.memory_space<vmem>>, vector<1x1x1x32x16xf32>
    %10 = vector.shape_cast %9 : vector<1x1x1x32x16xf32> to vector<32x16xf32>
    %cst_16 = arith.constant dense<0.000000e+00> : vector<16x16xf32>
    %11 = tpu.matmul %1, %10, %cst_16 {dimension_numbers = #tpu.dot_dimension_numbers<[1], [0], [0], [1], [0, 0, 1, 1], [], []>} : vector<16x32xf32>, vector<32x16xf32>, vector<16x16xf32> -> vector<16x16xf32>
    %c0_17 = arith.constant 0 : index
    %c2 = arith.constant 2 : index
    %c0_18 = arith.constant 0 : index
    %c0_19 = arith.constant 0 : index
    %c0_20 = arith.constant 0 : index
    %12 = vector.load %arg2[%c0_17, %c2, %c0_18, %c0_19, %c0_20] : memref<2x3x2x32x16xf32, #tpu.memory_space<vmem>>, vector<1x1x1x32x16xf32>
    %13 = vector.shape_cast %12 : vector<1x1x1x32x16xf32> to vector<32x16xf32>
    %cst_21 = arith.constant dense<0.000000e+00> : vector<16x16xf32>
    %14 = tpu.matmul %1, %13, %cst_21 {dimension_numbers = #tpu.dot_dimension_numbers<[1], [0], [0], [1], [0, 0, 1, 1], [], []>} : vector<16x32xf32>, vector<32x16xf32>, vector<16x16xf32> -> vector<16x16xf32>
    %15 = vector.shape_cast %8 : vector<16x16xf32> to vector<2x8x16xf32>
    %16 = vector.shape_cast %11 : vector<16x16xf32> to vector<2x8x16xf32>
    %17 = vector.shape_cast %14 : vector<16x16xf32> to vector<2x8x16xf32>
    "tpu.trace_start"() <{level = 10 : i32, message = "bqd,bkd->bqk"}> : () -> ()
    %cst_22 = arith.constant dense<0.000000e+00> : vector<2x8x8xf32>
    %18 = tpu.matmul %15, %16, %cst_22 {dimension_numbers = #tpu.dot_dimension_numbers<[2], [2], [1], [1], [0, 0, 0, 1, 1, 1], [0], [0]>} : vector<2x8x16xf32>, vector<2x8x16xf32>, vector<2x8x8xf32> -> vector<2x8x8xf32>
    %cst_23 = arith.constant -9.99999995E+11 : f32
    "tpu.trace_stop"() : () -> ()
    %19 = vector.broadcast %cst_23 : f32 to vector<2x8x8xf32>
    %20 = arith.select %4, %18, %19 : vector<2x8x8xi1>, vector<2x8x8xf32>
    %cst_24 = arith.constant dense<0xFF800000> : vector<2x8xf32>
    %21 = vector.multi_reduction <maximumf>, %20, %cst_24 [2] : vector<2x8x8xf32> to vector<2x8xf32>
    %22 = vector.shape_cast %21 : vector<2x8xf32> to vector<2x8x1xf32>
    %23 = vector.broadcast %22 : vector<2x8x1xf32> to vector<2x8x8xf32>
    %24 = arith.subf %20, %23 : vector<2x8x8xf32>
    %25 = math.exp %24 : vector<2x8x8xf32>
    %cst_25 = arith.constant dense<0.000000e+00> : vector<2x8xf32>
    %26 = vector.multi_reduction <add>, %25, %cst_25 [2] : vector<2x8x8xf32> to vector<2x8xf32>
    %27 = vector.shape_cast %26 : vector<2x8xf32> to vector<2x8x1xf32>
    %28 = vector.broadcast %27 : vector<2x8x1xf32> to vector<2x8x8xf32>
    %29 = arith.divf %25, %28 : vector<2x8x8xf32>
    "tpu.trace_start"() <{level = 10 : i32, message = "bqk,bkd->bqd"}> : () -> ()
    %cst_26 = arith.constant dense<0.000000e+00> : vector<2x8x16xf32>
    %30 = tpu.matmul %29, %17, %cst_26 {dimension_numbers = #tpu.dot_dimension_numbers<[2], [1], [1], [2], [0, 0, 0, 1, 1, 2], [0], [0]>} : vector<2x8x8xf32>, vector<2x8x16xf32>, vector<2x8x16xf32> -> vector<2x8x16xf32>
    "tpu.trace_stop"() : () -> ()
    %31 = vector.shape_cast %30 : vector<2x8x16xf32> to vector<16x16xf32>
    %c0_27 = arith.constant 0 : index
    %c0_28 = arith.constant 0 : index
    %c0_29 = arith.constant 0 : index
    %c0_30 = arith.constant 0 : index
    %32 = vector.load %arg3[%c0_27, %c0_28, %c0_29, %c0_30] : memref<2x2x16x32xf32, #tpu.memory_space<vmem>>, vector<1x1x16x32xf32>
    %33 = vector.shape_cast %32 : vector<1x1x16x32xf32> to vector<16x32xf32>
    %cst_31 = arith.constant dense<0.000000e+00> : vector<16x32xf32>
    %34 = tpu.matmul %31, %33, %cst_31 {dimension_numbers = #tpu.dot_dimension_numbers<[1], [0], [0], [1], [0, 0, 1, 1], [], []>} : vector<16x16xf32>, vector<16x32xf32>, vector<16x32xf32> -> vector<16x32xf32>
    %35 = arith.addf %5, %34 : vector<16x32xf32>
    %c0_32 = arith.constant 0 : index
    %c0_33 = arith.constant 0 : index
    %c1_34 = arith.constant 1 : index
    %c0_35 = arith.constant 0 : index
    %c0_36 = arith.constant 0 : index
    %36 = vector.load %arg2[%c0_32, %c0_33, %c1_34, %c0_35, %c0_36] : memref<2x3x2x32x16xf32, #tpu.memory_space<vmem>>, vector<1x1x1x32x16xf32>
    %37 = vector.shape_cast %36 : vector<1x1x1x32x16xf32> to vector<32x16xf32>
    %cst_37 = arith.constant dense<0.000000e+00> : vector<16x16xf32>
    %38 = tpu.matmul %1, %37, %cst_37 {dimension_numbers = #tpu.dot_dimension_numbers<[1], [0], [0], [1], [0, 0, 1, 1], [], []>} : vector<16x32xf32>, vector<32x16xf32>, vector<16x16xf32> -> vector<16x16xf32>
    %c0_38 = arith.constant 0 : index
    %c1_39 = arith.constant 1 : index
    %c1_40 = arith.constant 1 : index
    %c0_41 = arith.constant 0 : index
    %c0_42 = arith.constant 0 : index
    %39 = vector.load %arg2[%c0_38, %c1_39, %c1_40, %c0_41, %c0_42] : memref<2x3x2x32x16xf32, #tpu.memory_space<vmem>>, vector<1x1x1x32x16xf32>
    %40 = vector.shape_cast %39 : vector<1x1x1x32x16xf32> to vector<32x16xf32>
    %cst_43 = arith.constant dense<0.000000e+00> : vector<16x16xf32>
    %41 = tpu.matmul %1, %40, %cst_43 {dimension_numbers = #tpu.dot_dimension_numbers<[1], [0], [0], [1], [0, 0, 1, 1], [], []>} : vector<16x32xf32>, vector<32x16xf32>, vector<16x16xf32> -> vector<16x16xf32>
    %c0_44 = arith.constant 0 : index
    %c2_45 = arith.constant 2 : index
    %c1_46 = arith.constant 1 : index
    %c0_47 = arith.constant 0 : index
    %c0_48 = arith.constant 0 : index
    %42 = vector.load %arg2[%c0_44, %c2_45, %c1_46, %c0_47, %c0_48] : memref<2x3x2x32x16xf32, #tpu.memory_space<vmem>>, vector<1x1x1x32x16xf32>
    %43 = vector.shape_cast %42 : vector<1x1x1x32x16xf32> to vector<32x16xf32>
    %cst_49 = arith.constant dense<0.000000e+00> : vector<16x16xf32>
    %44 = tpu.matmul %1, %43, %cst_49 {dimension_numbers = #tpu.dot_dimension_numbers<[1], [0], [0], [1], [0, 0, 1, 1], [], []>} : vector<16x32xf32>, vector<32x16xf32>, vector<16x16xf32> -> vector<16x16xf32>
    %45 = vector.shape_cast %38 : vector<16x16xf32> to vector<2x8x16xf32>
    %46 = vector.shape_cast %41 : vector<16x16xf32> to vector<2x8x16xf32>
    %47 = vector.shape_cast %44 : vector<16x16xf32> to vector<2x8x16xf32>
    "tpu.trace_start"() <{level = 10 : i32, message = "bqd,bkd->bqk"}> : () -> ()
    %cst_50 = arith.constant dense<0.000000e+00> : vector<2x8x8xf32>
    %48 = tpu.matmul %45, %46, %cst_50 {dimension_numbers = #tpu.dot_dimension_numbers<[2], [2], [1], [1], [0, 0, 0, 1, 1, 1], [0], [0]>} : vector<2x8x16xf32>, vector<2x8x16xf32>, vector<2x8x8xf32> -> vector<2x8x8xf32>
    %cst_51 = arith.constant -9.99999995E+11 : f32
    "tpu.trace_stop"() : () -> ()
    %49 = vector.broadcast %cst_51 : f32 to vector<2x8x8xf32>
    %50 = arith.select %4, %48, %49 : vector<2x8x8xi1>, vector<2x8x8xf32>
    %cst_52 = arith.constant dense<0xFF800000> : vector<2x8xf32>
    %51 = vector.multi_reduction <maximumf>, %50, %cst_52 [2] : vector<2x8x8xf32> to vector<2x8xf32>
    %52 = vector.shape_cast %51 : vector<2x8xf32> to vector<2x8x1xf32>
    %53 = vector.broadcast %52 : vector<2x8x1xf32> to vector<2x8x8xf32>
    %54 = arith.subf %50, %53 : vector<2x8x8xf32>
    %55 = math.exp %54 : vector<2x8x8xf32>
    %cst_53 = arith.constant dense<0.000000e+00> : vector<2x8xf32>
    %56 = vector.multi_reduction <add>, %55, %cst_53 [2] : vector<2x8x8xf32> to vector<2x8xf32>
    %57 = vector.shape_cast %56 : vector<2x8xf32> to vector<2x8x1xf32>
    %58 = vector.broadcast %57 : vector<2x8x1xf32> to vector<2x8x8xf32>
    %59 = arith.divf %55, %58 : vector<2x8x8xf32>
    "tpu.trace_start"() <{level = 10 : i32, message = "bqk,bkd->bqd"}> : () -> ()
    %cst_54 = arith.constant dense<0.000000e+00> : vector<2x8x16xf32>
    %60 = tpu.matmul %59, %47, %cst_54 {dimension_numbers = #tpu.dot_dimension_numbers<[2], [1], [1], [2], [0, 0, 0, 1, 1, 2], [0], [0]>} : vector<2x8x8xf32>, vector<2x8x16xf32>, vector<2x8x16xf32> -> vector<2x8x16xf32>
    "tpu.trace_stop"() : () -> ()
    %61 = vector.shape_cast %60 : vector<2x8x16xf32> to vector<16x16xf32>
    %c0_55 = arith.constant 0 : index
    %c1_56 = arith.constant 1 : index
    %c0_57 = arith.constant 0 : index
    %c0_58 = arith.constant 0 : index
    %62 = vector.load %arg3[%c0_55, %c1_56, %c0_57, %c0_58] : memref<2x2x16x32xf32, #tpu.memory_space<vmem>>, vector<1x1x16x32xf32>
    %63 = vector.shape_cast %62 : vector<1x1x16x32xf32> to vector<16x32xf32>
    %cst_59 = arith.constant dense<0.000000e+00> : vector<16x32xf32>
    %64 = tpu.matmul %61, %63, %cst_59 {dimension_numbers = #tpu.dot_dimension_numbers<[1], [0], [0], [1], [0, 0, 1, 1], [], []>} : vector<16x16xf32>, vector<16x32xf32>, vector<16x32xf32> -> vector<16x32xf32>
    %65 = arith.addf %35, %64 : vector<16x32xf32>
    %66 = arith.addf %65, %1 : vector<16x32xf32>
    %cst_60 = arith.constant dense<0.000000e+00> : vector<16xf32>
    %67 = vector.multi_reduction <add>, %66, %cst_60 [1] : vector<16x32xf32> to vector<16xf32>
    %68 = vector.shape_cast %67 : vector<16xf32> to vector<16x1xf32>
    %cst_61 = arith.constant 3.200000e+01 : f32
    %69 = vector.broadcast %cst_61 : f32 to vector<16x1xf32>
    %70 = arith.divf %68, %69 : vector<16x1xf32>
    %71 = vector.broadcast %70 : vector<16x1xf32> to vector<16x32xf32>
    %72 = arith.subf %66, %71 : vector<16x32xf32>
    %73 = arith.mulf %72, %72 : vector<16x32xf32>
    %cst_62 = arith.constant dense<0.000000e+00> : vector<16xf32>
    %74 = vector.multi_reduction <add>, %73, %cst_62 [1] : vector<16x32xf32> to vector<16xf32>
    %75 = vector.shape_cast %74 : vector<16xf32> to vector<16x1xf32>
    %cst_63 = arith.constant 3.200000e+01 : f32
    %76 = vector.broadcast %cst_63 : f32 to vector<16x1xf32>
    %77 = arith.divf %75, %76 : vector<16x1xf32>
    %78 = vector.broadcast %70 : vector<16x1xf32> to vector<16x32xf32>
    %79 = arith.subf %66, %78 : vector<16x32xf32>
    %cst_64 = arith.constant 9.99999997E-7 : f32
    %80 = vector.broadcast %cst_64 : f32 to vector<16x1xf32>
    %81 = arith.addf %77, %80 : vector<16x1xf32>
    %82 = math.rsqrt %81 : vector<16x1xf32>
    %83 = vector.broadcast %82 : vector<16x1xf32> to vector<16x32xf32>
    %84 = arith.mulf %79, %83 : vector<16x32xf32>
    %c0_65 = arith.constant 0 : index
    %c0_66 = arith.constant 0 : index
    %c0_67 = arith.constant 0 : index
    %c0_68 = arith.constant 0 : index
    %85 = vector.load %arg7[%c0_65, %c0_66, %c0_67, %c0_68] : memref<2x3x1x32xf32, #tpu.memory_space<vmem>>, vector<1x1x1x32xf32>
    %86 = vector.shape_cast %85 : vector<1x1x1x32xf32> to vector<1x32xf32>
    %87 = vector.broadcast %86 : vector<1x32xf32> to vector<16x32xf32>
    %88 = arith.mulf %84, %87 : vector<16x32xf32>
    %c0_69 = arith.constant 0 : index
    %c1_70 = arith.constant 1 : index
    %c0_71 = arith.constant 0 : index
    %c0_72 = arith.constant 0 : index
    %89 = vector.load %arg7[%c0_69, %c1_70, %c0_71, %c0_72] : memref<2x3x1x32xf32, #tpu.memory_space<vmem>>, vector<1x1x1x32xf32>
    %90 = vector.shape_cast %89 : vector<1x1x1x32xf32> to vector<1x32xf32>
    %91 = vector.broadcast %90 : vector<1x32xf32> to vector<16x32xf32>
    %92 = arith.addf %88, %91 : vector<16x32xf32>
    %c0_73 = arith.constant 0 : index
    %c0_74 = arith.constant 0 : index
    %c0_75 = arith.constant 0 : index
    %93 = vector.load %arg4[%c0_73, %c0_74, %c0_75] : memref<2x32x128xf32, #tpu.memory_space<vmem>>, vector<1x32x128xf32>
    %94 = vector.shape_cast %93 : vector<1x32x128xf32> to vector<32x128xf32>
    %cst_76 = arith.constant dense<0.000000e+00> : vector<16x128xf32>
    %95 = tpu.matmul %92, %94, %cst_76 {dimension_numbers = #tpu.dot_dimension_numbers<[1], [0], [0], [1], [0, 0, 1, 1], [], []>} : vector<16x32xf32>, vector<32x128xf32>, vector<16x128xf32> -> vector<16x128xf32>
    %c0_77 = arith.constant 0 : index
    %c0_78 = arith.constant 0 : index
    %c0_79 = arith.constant 0 : index
    %96 = vector.load %arg5[%c0_77, %c0_78, %c0_79] : memref<2x1x128xf32, #tpu.memory_space<vmem>>, vector<1x1x128xf32>
    %97 = vector.shape_cast %96 : vector<1x1x128xf32> to vector<1x128xf32>
    %98 = vector.broadcast %97 : vector<1x128xf32> to vector<16x128xf32>
    %99 = arith.addf %95, %98 : vector<16x128xf32>
    %cst_80 = arith.constant 5.000000e-01 : f32
    %100 = vector.broadcast %cst_80 : f32 to vector<16x128xf32>
    %101 = arith.mulf %99, %100 : vector<16x128xf32>
    %cst_81 = arith.constant 0.707106769 : f32
    %102 = vector.broadcast %cst_81 : f32 to vector<16x128xf32>
    %103 = arith.mulf %99, %102 : vector<16x128xf32>
    %104 = math.erf %103 : vector<16x128xf32>
    %cst_82 = arith.constant 1.000000e+00 : f32
    %105 = vector.broadcast %cst_82 : f32 to vector<16x128xf32>
    %106 = arith.addf %105, %104 : vector<16x128xf32>
    %107 = arith.mulf %101, %106 : vector<16x128xf32>
    %c0_83 = arith.constant 0 : index
    %c0_84 = arith.constant 0 : index
    %c0_85 = arith.constant 0 : index
    %108 = vector.load %arg6[%c0_83, %c0_84, %c0_85] : memref<2x128x32xf32, #tpu.memory_space<vmem>>, vector<1x128x32xf32>
    %109 = vector.shape_cast %108 : vector<1x128x32xf32> to vector<128x32xf32>
    %cst_86 = arith.constant dense<0.000000e+00> : vector<16x32xf32>
    %110 = tpu.matmul %107, %109, %cst_86 {dimension_numbers = #tpu.dot_dimension_numbers<[1], [0], [0], [1], [0, 0, 1, 1], [], []>} : vector<16x128xf32>, vector<128x32xf32>, vector<16x32xf32> -> vector<16x32xf32>
    %c0_87 = arith.constant 0 : index
    %c2_88 = arith.constant 2 : index
    %c0_89 = arith.constant 0 : index
    %c0_90 = arith.constant 0 : index
    %111 = vector.load %arg7[%c0_87, %c2_88, %c0_89, %c0_90] : memref<2x3x1x32xf32, #tpu.memory_space<vmem>>, vector<1x1x1x32xf32>
    %112 = vector.shape_cast %111 : vector<1x1x1x32xf32> to vector<1x32xf32>
    %113 = vector.broadcast %112 : vector<1x32xf32> to vector<16x32xf32>
    %114 = arith.addf %110, %113 : vector<16x32xf32>
    %115 = arith.addf %114, %92 : vector<16x32xf32>
    %cst_91 = arith.constant 0.000000e+00 : f32
    %116 = vector.broadcast %cst_91 : f32 to vector<16x32xf32>
    %c1_92 = arith.constant 1 : index
    %c0_93 = arith.constant 0 : index
    %c0_94 = arith.constant 0 : index
    %c0_95 = arith.constant 0 : index
    %c0_96 = arith.constant 0 : index
    %117 = vector.load %arg2[%c1_92, %c0_93, %c0_94, %c0_95, %c0_96] : memref<2x3x2x32x16xf32, #tpu.memory_space<vmem>>, vector<1x1x1x32x16xf32>
    %118 = vector.shape_cast %117 : vector<1x1x1x32x16xf32> to vector<32x16xf32>
    %cst_97 = arith.constant dense<0.000000e+00> : vector<16x16xf32>
    %119 = tpu.matmul %115, %118, %cst_97 {dimension_numbers = #tpu.dot_dimension_numbers<[1], [0], [0], [1], [0, 0, 1, 1], [], []>} : vector<16x32xf32>, vector<32x16xf32>, vector<16x16xf32> -> vector<16x16xf32>
    %c1_98 = arith.constant 1 : index
    %c1_99 = arith.constant 1 : index
    %c0_100 = arith.constant 0 : index
    %c0_101 = arith.constant 0 : index
    %c0_102 = arith.constant 0 : index
    %120 = vector.load %arg2[%c1_98, %c1_99, %c0_100, %c0_101, %c0_102] : memref<2x3x2x32x16xf32, #tpu.memory_space<vmem>>, vector<1x1x1x32x16xf32>
    %121 = vector.shape_cast %120 : vector<1x1x1x32x16xf32> to vector<32x16xf32>
    %cst_103 = arith.constant dense<0.000000e+00> : vector<16x16xf32>
    %122 = tpu.matmul %115, %121, %cst_103 {dimension_numbers = #tpu.dot_dimension_numbers<[1], [0], [0], [1], [0, 0, 1, 1], [], []>} : vector<16x32xf32>, vector<32x16xf32>, vector<16x16xf32> -> vector<16x16xf32>
    %c1_104 = arith.constant 1 : index
    %c2_105 = arith.constant 2 : index
    %c0_106 = arith.constant 0 : index
    %c0_107 = arith.constant 0 : index
    %c0_108 = arith.constant 0 : index
    %123 = vector.load %arg2[%c1_104, %c2_105, %c0_106, %c0_107, %c0_108] : memref<2x3x2x32x16xf32, #tpu.memory_space<vmem>>, vector<1x1x1x32x16xf32>
    %124 = vector.shape_cast %123 : vector<1x1x1x32x16xf32> to vector<32x16xf32>
    %cst_109 = arith.constant dense<0.000000e+00> : vector<16x16xf32>
    %125 = tpu.matmul %115, %124, %cst_109 {dimension_numbers = #tpu.dot_dimension_numbers<[1], [0], [0], [1], [0, 0, 1, 1], [], []>} : vector<16x32xf32>, vector<32x16xf32>, vector<16x16xf32> -> vector<16x16xf32>
    %126 = vector.shape_cast %119 : vector<16x16xf32> to vector<2x8x16xf32>
    %127 = vector.shape_cast %122 : vector<16x16xf32> to vector<2x8x16xf32>
    %128 = vector.shape_cast %125 : vector<16x16xf32> to vector<2x8x16xf32>
    "tpu.trace_start"() <{level = 10 : i32, message = "bqd,bkd->bqk"}> : () -> ()
    %cst_110 = arith.constant dense<0.000000e+00> : vector<2x8x8xf32>
    %129 = tpu.matmul %126, %127, %cst_110 {dimension_numbers = #tpu.dot_dimension_numbers<[2], [2], [1], [1], [0, 0, 0, 1, 1, 1], [0], [0]>} : vector<2x8x16xf32>, vector<2x8x16xf32>, vector<2x8x8xf32> -> vector<2x8x8xf32>
    %cst_111 = arith.constant -9.99999995E+11 : f32
    "tpu.trace_stop"() : () -> ()
    %130 = vector.broadcast %cst_111 : f32 to vector<2x8x8xf32>
    %131 = arith.select %4, %129, %130 : vector<2x8x8xi1>, vector<2x8x8xf32>
    %cst_112 = arith.constant dense<0xFF800000> : vector<2x8xf32>
    %132 = vector.multi_reduction <maximumf>, %131, %cst_112 [2] : vector<2x8x8xf32> to vector<2x8xf32>
    %133 = vector.shape_cast %132 : vector<2x8xf32> to vector<2x8x1xf32>
    %134 = vector.broadcast %133 : vector<2x8x1xf32> to vector<2x8x8xf32>
    %135 = arith.subf %131, %134 : vector<2x8x8xf32>
    %136 = math.exp %135 : vector<2x8x8xf32>
    %cst_113 = arith.constant dense<0.000000e+00> : vector<2x8xf32>
    %137 = vector.multi_reduction <add>, %136, %cst_113 [2] : vector<2x8x8xf32> to vector<2x8xf32>
    %138 = vector.shape_cast %137 : vector<2x8xf32> to vector<2x8x1xf32>
    %139 = vector.broadcast %138 : vector<2x8x1xf32> to vector<2x8x8xf32>
    %140 = arith.divf %136, %139 : vector<2x8x8xf32>
    "tpu.trace_start"() <{level = 10 : i32, message = "bqk,bkd->bqd"}> : () -> ()
    %cst_114 = arith.constant dense<0.000000e+00> : vector<2x8x16xf32>
    %141 = tpu.matmul %140, %128, %cst_114 {dimension_numbers = #tpu.dot_dimension_numbers<[2], [1], [1], [2], [0, 0, 0, 1, 1, 2], [0], [0]>} : vector<2x8x8xf32>, vector<2x8x16xf32>, vector<2x8x16xf32> -> vector<2x8x16xf32>
    "tpu.trace_stop"() : () -> ()
    %142 = vector.shape_cast %141 : vector<2x8x16xf32> to vector<16x16xf32>
    %c1_115 = arith.constant 1 : index
    %c0_116 = arith.constant 0 : index
    %c0_117 = arith.constant 0 : index
    %c0_118 = arith.constant 0 : index
    %143 = vector.load %arg3[%c1_115, %c0_116, %c0_117, %c0_118] : memref<2x2x16x32xf32, #tpu.memory_space<vmem>>, vector<1x1x16x32xf32>
    %144 = vector.shape_cast %143 : vector<1x1x16x32xf32> to vector<16x32xf32>
    %cst_119 = arith.constant dense<0.000000e+00> : vector<16x32xf32>
    %145 = tpu.matmul %142, %144, %cst_119 {dimension_numbers = #tpu.dot_dimension_numbers<[1], [0], [0], [1], [0, 0, 1, 1], [], []>} : vector<16x16xf32>, vector<16x32xf32>, vector<16x32xf32> -> vector<16x32xf32>
    %146 = arith.addf %116, %145 : vector<16x32xf32>
    %c1_120 = arith.constant 1 : index
    %c0_121 = arith.constant 0 : index
    %c1_122 = arith.constant 1 : index
    %c0_123 = arith.constant 0 : index
    %c0_124 = arith.constant 0 : index
    %147 = vector.load %arg2[%c1_120, %c0_121, %c1_122, %c0_123, %c0_124] : memref<2x3x2x32x16xf32, #tpu.memory_space<vmem>>, vector<1x1x1x32x16xf32>
    %148 = vector.shape_cast %147 : vector<1x1x1x32x16xf32> to vector<32x16xf32>
    %cst_125 = arith.constant dense<0.000000e+00> : vector<16x16xf32>
    %149 = tpu.matmul %115, %148, %cst_125 {dimension_numbers = #tpu.dot_dimension_numbers<[1], [0], [0], [1], [0, 0, 1, 1], [], []>} : vector<16x32xf32>, vector<32x16xf32>, vector<16x16xf32> -> vector<16x16xf32>
    %c1_126 = arith.constant 1 : index
    %c1_127 = arith.constant 1 : index
    %c1_128 = arith.constant 1 : index
    %c0_129 = arith.constant 0 : index
    %c0_130 = arith.constant 0 : index
    %150 = vector.load %arg2[%c1_126, %c1_127, %c1_128, %c0_129, %c0_130] : memref<2x3x2x32x16xf32, #tpu.memory_space<vmem>>, vector<1x1x1x32x16xf32>
    %151 = vector.shape_cast %150 : vector<1x1x1x32x16xf32> to vector<32x16xf32>
    %cst_131 = arith.constant dense<0.000000e+00> : vector<16x16xf32>
    %152 = tpu.matmul %115, %151, %cst_131 {dimension_numbers = #tpu.dot_dimension_numbers<[1], [0], [0], [1], [0, 0, 1, 1], [], []>} : vector<16x32xf32>, vector<32x16xf32>, vector<16x16xf32> -> vector<16x16xf32>
    %c1_132 = arith.constant 1 : index
    %c2_133 = arith.constant 2 : index
    %c1_134 = arith.constant 1 : index
    %c0_135 = arith.constant 0 : index
    %c0_136 = arith.constant 0 : index
    %153 = vector.load %arg2[%c1_132, %c2_133, %c1_134, %c0_135, %c0_136] : memref<2x3x2x32x16xf32, #tpu.memory_space<vmem>>, vector<1x1x1x32x16xf32>
    %154 = vector.shape_cast %153 : vector<1x1x1x32x16xf32> to vector<32x16xf32>
    %cst_137 = arith.constant dense<0.000000e+00> : vector<16x16xf32>
    %155 = tpu.matmul %115, %154, %cst_137 {dimension_numbers = #tpu.dot_dimension_numbers<[1], [0], [0], [1], [0, 0, 1, 1], [], []>} : vector<16x32xf32>, vector<32x16xf32>, vector<16x16xf32> -> vector<16x16xf32>
    %156 = vector.shape_cast %149 : vector<16x16xf32> to vector<2x8x16xf32>
    %157 = vector.shape_cast %152 : vector<16x16xf32> to vector<2x8x16xf32>
    %158 = vector.shape_cast %155 : vector<16x16xf32> to vector<2x8x16xf32>
    "tpu.trace_start"() <{level = 10 : i32, message = "bqd,bkd->bqk"}> : () -> ()
    %cst_138 = arith.constant dense<0.000000e+00> : vector<2x8x8xf32>
    %159 = tpu.matmul %156, %157, %cst_138 {dimension_numbers = #tpu.dot_dimension_numbers<[2], [2], [1], [1], [0, 0, 0, 1, 1, 1], [0], [0]>} : vector<2x8x16xf32>, vector<2x8x16xf32>, vector<2x8x8xf32> -> vector<2x8x8xf32>
    %cst_139 = arith.constant -9.99999995E+11 : f32
    "tpu.trace_stop"() : () -> ()
    %160 = vector.broadcast %cst_139 : f32 to vector<2x8x8xf32>
    %161 = arith.select %4, %159, %160 : vector<2x8x8xi1>, vector<2x8x8xf32>
    %cst_140 = arith.constant dense<0xFF800000> : vector<2x8xf32>
    %162 = vector.multi_reduction <maximumf>, %161, %cst_140 [2] : vector<2x8x8xf32> to vector<2x8xf32>
    %163 = vector.shape_cast %162 : vector<2x8xf32> to vector<2x8x1xf32>
    %164 = vector.broadcast %163 : vector<2x8x1xf32> to vector<2x8x8xf32>
    %165 = arith.subf %161, %164 : vector<2x8x8xf32>
    %166 = math.exp %165 : vector<2x8x8xf32>
    %cst_141 = arith.constant dense<0.000000e+00> : vector<2x8xf32>
    %167 = vector.multi_reduction <add>, %166, %cst_141 [2] : vector<2x8x8xf32> to vector<2x8xf32>
    %168 = vector.shape_cast %167 : vector<2x8xf32> to vector<2x8x1xf32>
    %169 = vector.broadcast %168 : vector<2x8x1xf32> to vector<2x8x8xf32>
    %170 = arith.divf %166, %169 : vector<2x8x8xf32>
    "tpu.trace_start"() <{level = 10 : i32, message = "bqk,bkd->bqd"}> : () -> ()
    %cst_142 = arith.constant dense<0.000000e+00> : vector<2x8x16xf32>
    %171 = tpu.matmul %170, %158, %cst_142 {dimension_numbers = #tpu.dot_dimension_numbers<[2], [1], [1], [2], [0, 0, 0, 1, 1, 2], [0], [0]>} : vector<2x8x8xf32>, vector<2x8x16xf32>, vector<2x8x16xf32> -> vector<2x8x16xf32>
    "tpu.trace_stop"() : () -> ()
    %172 = vector.shape_cast %171 : vector<2x8x16xf32> to vector<16x16xf32>
    %c1_143 = arith.constant 1 : index
    %c1_144 = arith.constant 1 : index
    %c0_145 = arith.constant 0 : index
    %c0_146 = arith.constant 0 : index
    %173 = vector.load %arg3[%c1_143, %c1_144, %c0_145, %c0_146] : memref<2x2x16x32xf32, #tpu.memory_space<vmem>>, vector<1x1x16x32xf32>
    %174 = vector.shape_cast %173 : vector<1x1x16x32xf32> to vector<16x32xf32>
    %cst_147 = arith.constant dense<0.000000e+00> : vector<16x32xf32>
    %175 = tpu.matmul %172, %174, %cst_147 {dimension_numbers = #tpu.dot_dimension_numbers<[1], [0], [0], [1], [0, 0, 1, 1], [], []>} : vector<16x16xf32>, vector<16x32xf32>, vector<16x32xf32> -> vector<16x32xf32>
    %176 = arith.addf %146, %175 : vector<16x32xf32>
    %177 = arith.addf %176, %115 : vector<16x32xf32>
    %cst_148 = arith.constant dense<0.000000e+00> : vector<16xf32>
    %178 = vector.multi_reduction <add>, %177, %cst_148 [1] : vector<16x32xf32> to vector<16xf32>
    %179 = vector.shape_cast %178 : vector<16xf32> to vector<16x1xf32>
    %cst_149 = arith.constant 3.200000e+01 : f32
    %180 = vector.broadcast %cst_149 : f32 to vector<16x1xf32>
    %181 = arith.divf %179, %180 : vector<16x1xf32>
    %182 = vector.broadcast %181 : vector<16x1xf32> to vector<16x32xf32>
    %183 = arith.subf %177, %182 : vector<16x32xf32>
    %184 = arith.mulf %183, %183 : vector<16x32xf32>
    %cst_150 = arith.constant dense<0.000000e+00> : vector<16xf32>
    %185 = vector.multi_reduction <add>, %184, %cst_150 [1] : vector<16x32xf32> to vector<16xf32>
    %186 = vector.shape_cast %185 : vector<16xf32> to vector<16x1xf32>
    %cst_151 = arith.constant 3.200000e+01 : f32
    %187 = vector.broadcast %cst_151 : f32 to vector<16x1xf32>
    %188 = arith.divf %186, %187 : vector<16x1xf32>
    %189 = vector.broadcast %181 : vector<16x1xf32> to vector<16x32xf32>
    %190 = arith.subf %177, %189 : vector<16x32xf32>
    %cst_152 = arith.constant 9.99999997E-7 : f32
    %191 = vector.broadcast %cst_152 : f32 to vector<16x1xf32>
    %192 = arith.addf %188, %191 : vector<16x1xf32>
    %193 = math.rsqrt %192 : vector<16x1xf32>
    %194 = vector.broadcast %193 : vector<16x1xf32> to vector<16x32xf32>
    %195 = arith.mulf %190, %194 : vector<16x32xf32>
    %c1_153 = arith.constant 1 : index
    %c0_154 = arith.constant 0 : index
    %c0_155 = arith.constant 0 : index
    %c0_156 = arith.constant 0 : index
    %196 = vector.load %arg7[%c1_153, %c0_154, %c0_155, %c0_156] : memref<2x3x1x32xf32, #tpu.memory_space<vmem>>, vector<1x1x1x32xf32>
    %197 = vector.shape_cast %196 : vector<1x1x1x32xf32> to vector<1x32xf32>
    %198 = vector.broadcast %197 : vector<1x32xf32> to vector<16x32xf32>
    %199 = arith.mulf %195, %198 : vector<16x32xf32>
    %c1_157 = arith.constant 1 : index
    %c1_158 = arith.constant 1 : index
    %c0_159 = arith.constant 0 : index
    %c0_160 = arith.constant 0 : index
    %200 = vector.load %arg7[%c1_157, %c1_158, %c0_159, %c0_160] : memref<2x3x1x32xf32, #tpu.memory_space<vmem>>, vector<1x1x1x32xf32>
    %201 = vector.shape_cast %200 : vector<1x1x1x32xf32> to vector<1x32xf32>
    %202 = vector.broadcast %201 : vector<1x32xf32> to vector<16x32xf32>
    %203 = arith.addf %199, %202 : vector<16x32xf32>
    %c1_161 = arith.constant 1 : index
    %c0_162 = arith.constant 0 : index
    %c0_163 = arith.constant 0 : index
    %204 = vector.load %arg4[%c1_161, %c0_162, %c0_163] : memref<2x32x128xf32, #tpu.memory_space<vmem>>, vector<1x32x128xf32>
    %205 = vector.shape_cast %204 : vector<1x32x128xf32> to vector<32x128xf32>
    %cst_164 = arith.constant dense<0.000000e+00> : vector<16x128xf32>
    %206 = tpu.matmul %203, %205, %cst_164 {dimension_numbers = #tpu.dot_dimension_numbers<[1], [0], [0], [1], [0, 0, 1, 1], [], []>} : vector<16x32xf32>, vector<32x128xf32>, vector<16x128xf32> -> vector<16x128xf32>
    %c1_165 = arith.constant 1 : index
    %c0_166 = arith.constant 0 : index
    %c0_167 = arith.constant 0 : index
    %207 = vector.load %arg5[%c1_165, %c0_166, %c0_167] : memref<2x1x128xf32, #tpu.memory_space<vmem>>, vector<1x1x128xf32>
    %208 = vector.shape_cast %207 : vector<1x1x128xf32> to vector<1x128xf32>
    %209 = vector.broadcast %208 : vector<1x128xf32> to vector<16x128xf32>
    %210 = arith.addf %206, %209 : vector<16x128xf32>
    %cst_168 = arith.constant 5.000000e-01 : f32
    %211 = vector.broadcast %cst_168 : f32 to vector<16x128xf32>
    %212 = arith.mulf %210, %211 : vector<16x128xf32>
    %cst_169 = arith.constant 0.707106769 : f32
    %213 = vector.broadcast %cst_169 : f32 to vector<16x128xf32>
    %214 = arith.mulf %210, %213 : vector<16x128xf32>
    %215 = math.erf %214 : vector<16x128xf32>
    %cst_170 = arith.constant 1.000000e+00 : f32
    %216 = vector.broadcast %cst_170 : f32 to vector<16x128xf32>
    %217 = arith.addf %216, %215 : vector<16x128xf32>
    %218 = arith.mulf %212, %217 : vector<16x128xf32>
    %c1_171 = arith.constant 1 : index
    %c0_172 = arith.constant 0 : index
    %c0_173 = arith.constant 0 : index
    %219 = vector.load %arg6[%c1_171, %c0_172, %c0_173] : memref<2x128x32xf32, #tpu.memory_space<vmem>>, vector<1x128x32xf32>
    %220 = vector.shape_cast %219 : vector<1x128x32xf32> to vector<128x32xf32>
    %cst_174 = arith.constant dense<0.000000e+00> : vector<16x32xf32>
    %221 = tpu.matmul %218, %220, %cst_174 {dimension_numbers = #tpu.dot_dimension_numbers<[1], [0], [0], [1], [0, 0, 1, 1], [], []>} : vector<16x128xf32>, vector<128x32xf32>, vector<16x32xf32> -> vector<16x32xf32>
    %c1_175 = arith.constant 1 : index
    %c2_176 = arith.constant 2 : index
    %c0_177 = arith.constant 0 : index
    %c0_178 = arith.constant 0 : index
    %222 = vector.load %arg7[%c1_175, %c2_176, %c0_177, %c0_178] : memref<2x3x1x32xf32, #tpu.memory_space<vmem>>, vector<1x1x1x32xf32>
    %223 = vector.shape_cast %222 : vector<1x1x1x32xf32> to vector<1x32xf32>
    %224 = vector.broadcast %223 : vector<1x32xf32> to vector<16x32xf32>
    %225 = arith.addf %221, %224 : vector<16x32xf32>
    %226 = arith.addf %225, %203 : vector<16x32xf32>
    %227 = vector.shape_cast %226 : vector<16x32xf32> to vector<2x8x32xf32>
    %c0_179 = arith.constant 0 : index
    %c0_180 = arith.constant 0 : index
    %c0_181 = arith.constant 0 : index
    %228 = vector.load %arg8[%c0_179, %c0_180, %c0_181] : memref<2x8x32xf32, #tpu.memory_space<vmem>>, vector<2x8x32xf32>
    tpu.vector_store %arg8[%c0_179, %c0_180, %c0_181], %227 {strides = array<i32>} : memref<2x8x32xf32, #tpu.memory_space<vmem>>, vector<2x8x32xf32>,
    return
  }
}

</mosaic_0001>

<bundles_post_ra>
// kernel: tpu_custom_call.1
= control target key start
LH: loop header
LB: loop body
LE: loop exit
PB: predicated region body
PF: predicated region fallthrough
CT: control target
= control target key end

     0   :  { %vm40_vm0 = vcmask 261120   ;;  %s4671_s0 = inlined_call_operand.vmem [shape: f32[2,8,32], index: 0, kind: input, shape index: {}]   ;;  %s4672_s1 = inlined_call_operand.vmem [shape: f32[2,8,8], index: 1, kind: input, shape index: {}]   ;;  %s4673_s2 = inlined_call_operand.vmem [shape: f32[2,3,2,32,16], index: 2, kind: input, shape index: {}]   ;;  %s4674_s3 = inlined_call_operand.vmem [shape: f32[2,2,16,32], index: 3, kind: input, shape index: {}]   ;;  %s4675_s4 = inlined_call_operand.vmem [shape: f32[2,32,128], index: 4, kind: input, shape index: {}]   ;;  %s4676_s5 = inlined_call_operand.vmem [shape: f32[2,1,128], index: 5, kind: input, shape index: {}]   ;;  %s4677_s6 = inlined_call_operand.vmem [shape: f32[2,128,32], index: 6, kind: input, shape index: {}]   ;;  %s4678_s7 = inlined_call_operand.vmem [shape: f32[2,3,1,32], index: 7, kind: input, shape index: {}]   ;;  %s4679_s8 = inlined_call_operand.hbm [shape: f32[2,8,32], index: 8, kind: output, shape index: {}]  }
   0x1   :  { %v36_v0 = vld [vmem:[%s4673_s2] sm:$0xff]  ;;  %v37_v1 = vld [vmem:[%s4673_s2 + $0x8] sm:$0xff]  ;;  %v38_v2 = vld [vmem:[%s4673_s2 + $0x10] sm:$0xff] }
   0x2   :  { %v3800_v3 = vpack.c.bf16 %v37_v1, %v36_v0  ;;  %v39_v4 = vld [vmem:[%s4673_s2 + $0x18] sm:$0xff]  ;;  %v4138_v5 = vld [vmem:[%s4671_s0] sm:$0xff]  ;;  %v3159_v8 = vld [vmem:[%s4673_s2 + $0x48] sm:$0xff] }
   0x3   :  { %v3804_v6 = vpack.c.bf16 %v39_v4, %v38_v2  ;;  %3476 = vmatprep.mubr.msk.f32.mxu1 %vm40_vm0, %v4138_v5  ;;  %v3158_v7 = vld [vmem:[%s4673_s2 + $0x40] sm:$0xff] }
   0x4   :  { %3801 = vmatprep.subr.bf16.mxu1 %v3800_v3 }
   0x5   :  { %3803 = vmatpush3.bf16.msra.mxu1 %v3800_v3 }
   0x6   :  { %13 = vsyncpa [#allocation3], 0  ;;  %3805 = vmatprep.subr.bf16.mxu1 %v3804_v6  ;;  %v3808_v9 = vpack.c.bf16 %v3159_v8, %v3158_v7  ;;  %v3160_v10 = vld [vmem:[%s4673_s2 + $0x50] sm:$0xff]  ;;  %v3161_v11 = vld [vmem:[%s4673_s2 + $0x58] sm:$0xff]  ;;  %v4073_v20 = vmov 0.0   ;;  %vm4074_vm1 = vmmov 0  }
   0x7   :  { %v4157_v12 = vld [vmem:[%s4671_s0 + $0x8] sm:$0xff]  ;;  %v3812_v13 = vpack.c.bf16 %v3161_v11, %v3160_v10  ;;  %v3164_v14 = vld [vmem:[%s4673_s2 + $0x80] sm:$0xff]  ;;  %v3166_v17 = vld [vmem:[%s4673_s2 + $0x90] sm:$0xff]  ;;  %3511 = vmatprep.subr.mxu0 %v4073_v20  ;;  %3513 = vmatprep.mubr.msk.f32.mxu0 %vm4074_vm1, %v4073_v20  ;;  %vm282_vm2 = vcmask 130048   ;;  %vm437_vm5 = vcmask 64512  }
   0x8   :  { %v3165_v15 = vld [vmem:[%s4673_s2 + $0x88] sm:$0xff]  ;;  %v3167_v18 = vld [vmem:[%s4673_s2 + $0x98] sm:$0xff]  ;;  %v4205_v29 = vld [vmem:[%s4672_s1] sm:$0xff] }
   0x9   :  { %3807 = vmatpush3.bf16.msra.mxu1 %v3804_v6  ;;  %v3816_v16 = vpack.c.bf16 %v3165_v15, %v3164_v14  ;;  %v3820_v19 = vpack.c.bf16 %v3167_v18, %v3166_v17  ;;  %v4200_v27 = vld [vmem:[%s4672_s1 + $0x8] sm:$0xff]  ;;  %vm34_vm4 = vcmp.gt.f32.partialorder %v4205_v29, 0.5  ;;  %v3182_v47 = vld [vmem:[%s4673_s2 + $0x60] sm:$0xff]  ;;  %v3184_v55 = vld [vmem:[%s4673_s2 + $0x70] sm:$0xff] }
   0xa   :  { %3809 = vmatprep.subr.bf16.mxu1 %v3808_v9  ;;  %vm35_vm3 = vcmp.gt.f32.partialorder %v4200_v27, 0.5  ;;  %v3183_v48 = vld [vmem:[%s4673_s2 + $0x68] sm:$0xff]  ;;  %v3176_v50 = vld [vmem:[%s4673_s2 + $0x20] sm:$0xff]  ;;  %v3185_v56 = vld [vmem:[%s4673_s2 + $0x78] sm:$0xff] }
   0xb   :  { %v3832_v49 = vpack.c.bf16 %v3183_v48, %v3182_v47  ;;  %v3177_v51 = vld [vmem:[%s4673_s2 + $0x28] sm:$0xff]  ;;  %v3836_v59 = vpack.c.bf16 %v3185_v56, %v3184_v55  ;;  %v3178_v60 = vld [vmem:[%s4673_s2 + $0x30] sm:$0xff]  ;;  %v3179_v61 = vld [vmem:[%s4673_s2 + $0x38] sm:$0xff] }
   0xc   :  { %3477 = vmatmul.mubr.msk.f32.vlgmr.msra.gmra.mrb[0].mxu1 %vm40_vm0, %v4157_v12  ;;  %v3824_v52 = vpack.c.bf16 %v3177_v51, %v3176_v50  ;;  %v3828_v0 = vpack.c.bf16 %v3179_v61, %v3178_v60  ;;  %v3188_v10 = vld [vmem:[%s4673_s2 + $0xa0] sm:$0xff]  ;;  %v3189_v11 = vld [vmem:[%s4673_s2 + $0xa8] sm:$0xff]  ;;  %v3191_v15 = vld [vmem:[%s4673_s2 + $0xb8] sm:$0xff] }
   0xd   :  { %3811 = vmatpush3.bf16.msra.mxu1 %v3808_v9  ;;  %3487 = vmatprep.mubr.msk.f32.mxu1 %vm40_vm0, %v4138_v5  ;;  %v3840_v14 = vpack.c.bf16 %v3189_v11, %v3188_v10  ;;  %v3201_v47 = vld [vmem:[%s4674_s3 + $0x18] sm:$0xff]  ;;  %v607_v50 = vld [vmem:[%s4674_s3 + $0x8] sm:$0xff]  ;;  %v1385_v10 = vld [vmem:[%s4675_s4 + $0x10] sm:$0xff] }
   0xe   :  { %3813 = vmatprep.subr.bf16.mxu1 %v3812_v13  ;;  %v1386_v11 = vld [vmem:[%s4675_s4 + $0x18] sm:$0xff] }
  0x11   :  { %3815 = vmatpush3.bf16.msra.mxu1 %v3812_v13  ;;  %v3190_v13 = vld [vmem:[%s4673_s2 + $0xb0] sm:$0xff] }
  0x12   :  { %3817 = vmatprep.subr.bf16.mxu1 %v3816_v16 }
  0x14   :  { %3488 = vmatmul.mubr.msk.f32.vlgmr.msra.gmra.mrb[2].mxu1 %vm40_vm0, %v4157_v12 }
  0x15   :  { %3819 = vmatpush3.bf16.msra.mxu1 %v3816_v16  ;;  %3498 = vmatprep.mubr.msk.f32.mxu1 %vm40_vm0, %v4138_v5  ;;  %v3844_v16 = vpack.c.bf16 %v3191_v15, %v3190_v13  ;;  %v3860_v13 = vpack.c.bf16 %v1386_v11, %v1385_v10  ;;  %v1486_v15 = vld [vmem:[%s4677_s6 + $0x8] sm:$0xff]  ;;  %v3216_v10 = vld [vmem:[%s4673_s2 + $0xd0] sm:$0xff]  ;;  %v3217_v11 = vld [vmem:[%s4673_s2 + $0xd8] sm:$0xff] }
  0x16   :  { %3821 = vmatprep.subr.bf16.mxu1 %v3820_v19 }
  0x19   :  { %3823 = vmatpush3.bf16.msra.mxu1 %v3820_v19 }
  0x1a   :  { %3501 = vmatprep.subr.mxu1 %v4073_v20 }
  0x1c   :  { %3499 = vmatmul.mubr.msk.f32.vlgmr.msra.gmra.mrb[4].mxu1 %vm40_vm0, %v4157_v12 }
  0x1d   :  { %3503 = vmatprep.mubr.msk.f32.mxu1 %vm4074_vm1, %v4073_v20 }
  0xdf   :  { %v3478_v21 = vpop.f32.mrb[0].mxu1 }
  0xe0   :  { %v113_v22 = vpop.f32.mrb[1].mxu1 }
  0xe7   :  { %v3489_v23 = vpop.f32.mrb[2].mxu1 }
  0xe8   :  { %v193_v24 = vpop.f32.mrb[3].mxu1 }
  0xe9   :  { %3502 = vmatpush3.xpose.msk.msra.mxu1 %vm282_vm2, %v193_v24 }
  0xea   :  { %3506 = vmatprep.subr.mxu1 %v4073_v20 }
  0xec   :  { %3504 = vmatmul.mubr.msk.f32.vlgmr.msra.gmra.mrb[6].mxu1 %vm282_vm2, %v113_v22 }
  0xed   :  { %3507 = vmatpush3.xpose.msk.msra.mxu1 %vm282_vm2, %v3489_v23  ;;  %3508 = vmatprep.mubr.msk.f32.mxu1 %vm4074_vm1, %v4073_v20 }
  0xee   :  { %3516 = vmatprep.subr.mxu1 %v4073_v20 }
  0xef   :  { %v3500_v25 = vpop.f32.mrb[4].mxu1 }
  0xf0   :  { %3509 = vmatmul.mubr.msk.f32.vlgmr.msra.gmra.mrb[8].mxu1 %vm282_vm2, %v3478_v21  ;;  %v273_v26 = vpop.f32.mrb[5].mxu1 }
  0xf1   :  { %3518 = vmatprep.mubr.msk.f32.mxu1 %vm4074_vm1, %v4073_v20  ;;  %3517 = vmatpush3.msra.mxu1 %v3500_v25 }
  0xf2   :  { %3512 = vmatpush3.msra.mxu0 %v273_v26  ;;  %3833 = vmatprep.subr.bf16.mxu1 %v3832_v49 }
  0xf3   :  { %3825 = vmatprep.subr.bf16.mxu0 %v3824_v52 }
 0x1bf   :  { %v355_v28 = vpop.f32.mrb[6].mxu1 }
 0x1c0   :  { %v3505_v30 = vpop.f32.mrb[7].mxu1  ;;  %v435_v35 = vsel %vm34_vm4, %v355_v28, -1e+12 }
 0x1c1   :  { %v438_v36 = vsel %vm437_vm5, %v435_v35, -inf }
 0x1c3   :  { %v431_v31 = vpop.f32.mrb[8].mxu1 }
 0x1c4   :  { %v436_v32 = vsel %vm35_vm3, %v431_v31, -1e+12  ;;  %v3510_v33 = vpop.f32.mrb[9].mxu1 }
 0x1c5   :  { %v441_v34 = vsel %vm437_vm5, %v436_v32, -inf }
 0x1c6   :  { %442 = vmax.xlane.f32.xlu0 %v441_v34 }
 0x1ca   :  { %439 = vmax.xlane.f32.xlu0 %v438_v36 }
 0x253   :  { %v443_v37 = vpop.xlane.xlu0 %442 }
 0x254   :  { %v445_v38 = vsub.f32 %v436_v32, %v443_v37 }
 0x256   :  { %v448_v39 = vmul.f32 1.442695, %v445_v38 }
 0x257   :  { %v440_v40 = vpop.xlane.xlu0 %439 }
 0x258   :  { %4001 = vpow2.f32 %v448_v39  ;;  %v444_v41 = vsub.f32 %v435_v35, %v440_v40 }
 0x25a   :  { %v446_v42 = vmul.f32 1.442695, %v444_v41 }
 0x25c   :  { %4003 = vpow2.f32 %v446_v42 }
 0x262   :  { %v4002_v43 = vpop.eup %4001 }
 0x263   :  { %v453_v44 = vsel %vm437_vm5, %v4002_v43, 0.0 }
 0x264   :  { %454 = vadd.xlane.f32.xlu1 %v453_v44 }
 0x266   :  { %v4004_v45 = vpop.eup %4003 }
 0x267   :  { %v450_v46 = vsel %vm437_vm5, %v4004_v45, 0.0 }
 0x268   :  { %451 = vadd.xlane.f32.xlu1 %v450_v46  ;;  %v3200_v46 = vld [vmem:[%s4674_s3 + $0x10] sm:$0xff] }
 0x269   :  { %v3848_v48 = vpack.c.bf16 %v3201_v47, %v3200_v46  ;;  %v1494_v46 = vld [vmem:[%s4677_s6 + $0x48] sm:$0xff] }
 0x2f1   :  { %v455_v53 = vpop.xlane.xlu1 %454 }
 0x2f2   :  { %4005 = vrcp.f32 %v455_v53 }
 0x2f5   :  { %v452_v54 = vpop.xlane.xlu1 %451 }
 0x2f6   :  { %4007 = vrcp.f32 %v452_v54 }
 0x2fc   :  { %v4006_v57 = vpop.eup %4005 }
 0x2fd   :  { %v459_v58 = vmul.f32 %v4006_v57, %v4002_v43 }
 0x2ff   :  { %3519 = vmatmul.mubr.msk.f32.vlgmr.msra.gmra.mrb[10].mxu1 %vm437_vm5, %v459_v58 }
 0x300   :  { %v4008_v62 = vpop.eup %4007  ;;  %3835 = vmatpush3.bf16.msra.mxu1 %v3832_v49  ;;  %3540 = vmatprep.mubr.msk.f32.mxu1 %vm40_vm0, %v4138_v5  ;;  %v606_v49 = vld [vmem:[%s4674_s3] sm:$0xff] }
 0x301   :  { %3837 = vmatprep.subr.bf16.mxu1 %v3836_v59  ;;  %v457_v63 = vmul.f32 %v4008_v62, %v4004_v45  ;;  %v3852_v51 = vpack.c.bf16 %v607_v50, %v606_v49  ;;  %v1496_v49 = vld [vmem:[%s4677_s6 + $0x58] sm:$0xff] }
 0x303   :  { %3514 = vmatmul.mubr.msk.f32.vlgmr.msra.gmra.mrb[0].mxu0 %vm437_vm5, %v457_v63 }
 0x304   :  { %3827 = vmatpush3.bf16.msra.mxu0 %v3824_v52  ;;  %3839 = vmatpush3.bf16.msra.mxu1 %v3836_v59 }
 0x305   :  { %3829 = vmatprep.subr.bf16.mxu0 %v3828_v0  ;;  %3529 = vmatprep.mubr.msk.f32.mxu0 %vm40_vm0, %v4138_v5 }
 0x306   :  { %3554 = vmatprep.subr.mxu1 %v4073_v20 }
 0x307   :  { %3541 = vmatmul.mubr.msk.f32.vlgmr.msra.gmra.mrb[12].mxu1 %vm40_vm0, %v4157_v12 }
 0x308   :  { %3831 = vmatpush3.bf16.msra.mxu0 %v3828_v0  ;;  %3556 = vmatprep.mubr.msk.f32.mxu1 %vm4074_vm1, %v4073_v20 }
 0x309   :  { %3841 = vmatprep.subr.bf16.mxu0 %v3840_v14 }
 0x30b   :  { %3530 = vmatmul.mubr.msk.f32.vlgmr.msra.gmra.mrb[2].mxu0 %vm40_vm0, %v4157_v12 }
 0x30c   :  { %3551 = vmatprep.mubr.msk.f32.mxu0 %vm40_vm0, %v4138_v5  ;;  %3843 = vmatpush3.bf16.msra.mxu0 %v3840_v14  ;;  %v1485_v14 = vld [vmem:[%s4677_s6] sm:$0xff] }
 0x30d   :  { %3845 = vmatprep.subr.bf16.mxu0 %v3844_v16 }
 0x310   :  { %3847 = vmatpush3.bf16.msra.mxu0 %v3844_v16  ;;  %v1487_v16 = vld [vmem:[%s4677_s6 + $0x10] sm:$0xff] }
 0x311   :  { %3564 = vmatprep.subr.mxu0 %v4073_v20 }
 0x313   :  { %3552 = vmatmul.mubr.msk.f32.vlgmr.msra.gmra.mrb[4].mxu0 %vm40_vm0, %v4157_v12 }
 0x314   :  { %3566 = vmatprep.mubr.msk.f32.mxu0 %vm4074_vm1, %v4073_v20 }
 0x3d2   :  { %v4256_v1 = vpop.f32.mrb[10].mxu1 }
 0x3d3   :  { %v3520_v2 = vpop.f32.mrb[11].mxu1 }
 0x3d6   :  { %v4258_v3 = vpop.f32.mrb[0].mxu0 }
 0x3d7   :  { %v3515_v4 = vpop.f32.mrb[1].mxu0 }
 0x3da   :  { %v3542_v6 = vpop.f32.mrb[12].mxu1 }
 0x3db   :  { %v759_v7 = vpop.f32.mrb[13].mxu1 }
 0x3dc   :  { %3555 = vmatpush3.xpose.msk.msra.mxu1 %vm282_vm2, %v759_v7 }
 0x3dd   :  { %3559 = vmatprep.subr.mxu1 %v4073_v20 }
 0x3de   :  { %v3531_v8 = vpop.f32.mrb[2].mxu0 }
 0x3df   :  { %v679_v9 = vpop.f32.mrb[3].mxu0 }
 0x3e0   :  { %3557 = vmatmul.mubr.msk.f32.vlgmr.msra.gmra.mrb[14].mxu1 %vm282_vm2, %v679_v9 }
 0x3e1   :  { %3560 = vmatpush3.xpose.msk.msra.mxu1 %vm282_vm2, %v3542_v6  ;;  %3561 = vmatprep.mubr.msk.f32.mxu1 %vm4074_vm1, %v4073_v20 }
 0x3e2   :  { %3569 = vmatprep.subr.mxu1 %v4073_v20 }
 0x3e4   :  { %3562 = vmatmul.mubr.msk.f32.vlgmr.msra.gmra.mrb[16].mxu1 %vm282_vm2, %v3531_v8  ;;  %v1384_v8 = vld [vmem:[%s4675_s4 + $0x8] sm:$0xff] }
 0x3e5   :  { %3571 = vmatprep.mubr.msk.f32.mxu1 %vm4074_vm1, %v4073_v20 }
 0x3e6   :  { %v3553_v38 = vpop.f32.mrb[4].mxu0 }
 0x3e7   :  { %v839_v39 = vpop.f32.mrb[5].mxu0  ;;  %3570 = vmatpush3.msra.mxu1 %v3553_v38  ;;  %v3208_v38 = vld [vmem:[%s4678_s7 + $0x1] ss:$0 sm:$0xff] }
 0x3e8   :  { %3565 = vmatpush3.msra.mxu0 %v839_v39 }
 0x3e9   :  { %3849 = vmatprep.subr.bf16.mxu0 %v3848_v48 }
 0x4b3   :  { %v920_v17 = vpop.f32.mrb[14].mxu1 }
 0x4b4   :  { %v1000_v18 = vsel %vm34_vm4, %v920_v17, -1e+12  ;;  %v3558_v19 = vpop.f32.mrb[15].mxu1  ;;  %v3864_v17 = vpack.c.bf16 %v1486_v15, %v1485_v14  ;;  %v3220_v14 = vld [vmem:[%s4673_s2 + $0x100] sm:$0xff]  ;;  %v3221_v15 = vld [vmem:[%s4673_s2 + $0x108] sm:$0xff] }
 0x4b5   :  { %v1002_v21 = vsel %vm437_vm5, %v1000_v18, -inf }
 0x4b6   :  { %1003 = vmax.xlane.f32.xlu0 %v1002_v21  ;;  %v1489_v21 = vld [vmem:[%s4677_s6 + $0x20] sm:$0xff] }
 0x4b7   :  { %v996_v22 = vpop.f32.mrb[16].mxu1 }
 0x4b8   :  { %v1001_v23 = vsel %vm35_vm3, %v996_v22, -1e+12  ;;  %v3563_v24 = vpop.f32.mrb[17].mxu1  ;;  %v1490_v22 = vld [vmem:[%s4677_s6 + $0x28] sm:$0xff] }
 0x4b9   :  { %v1005_v25 = vsel %vm437_vm5, %v1001_v23, -inf }
 0x4ba   :  { %1006 = vmax.xlane.f32.xlu1 %v1005_v25 }
 0x543   :  { %v1004_v26 = vpop.xlane.xlu0 %1003 }
 0x544   :  { %v1008_v28 = vsub.f32 %v1000_v18, %v1004_v26  ;;  %v1488_v18 = vld [vmem:[%s4677_s6 + $0x18] sm:$0xff] }
 0x545   :  { %v3868_v19 = vpack.c.bf16 %v1488_v18, %v1487_v16  ;;  %v3904_v16 = vpack.c.bf16 %v3221_v15, %v3220_v14 }
 0x546   :  { %v1010_v30 = vmul.f32 1.442695, %v1008_v28 }
 0x547   :  { %v1007_v31 = vpop.xlane.xlu1 %1006 }
 0x548   :  { %4009 = vpow2.f32 %v1010_v30  ;;  %v1009_v32 = vsub.f32 %v1001_v23, %v1007_v31  ;;  %v3872_v23 = vpack.c.bf16 %v1490_v22, %v1489_v21 }
 0x54a   :  { %v1012_v33 = vmul.f32 1.442695, %v1009_v32 }
 0x54c   :  { %4011 = vpow2.f32 %v1012_v33  ;;  %v3206_v33 = vld [vmem:[%s4678_s7] ss:$0 sm:$0xff] }
 0x552   :  { %v4010_v34 = vpop.eup %4009 }
 0x553   :  { %v1014_v35 = vsel %vm437_vm5, %v4010_v34, 0.0 }
 0x554   :  { %1015 = vadd.xlane.f32.xlu0 %v1014_v35 }
 0x556   :  { %v4012_v36 = vpop.eup %4011 }
 0x557   :  { %v1017_v37 = vsel %vm437_vm5, %v4012_v36, 0.0 }
 0x558   :  { %1018 = vadd.xlane.f32.xlu1 %v1017_v37 }
 0x5e1   :  { %v1016_v40 = vpop.xlane.xlu0 %1015 }
 0x5e2   :  { %4013 = vrcp.f32 %v1016_v40 }
 0x5e5   :  { %v1019_v41 = vpop.xlane.xlu1 %1018 }
 0x5e6   :  { %4015 = vrcp.f32 %v1019_v41 }
 0x5ec   :  { %v4014_v42 = vpop.eup %4013 }
 0x5ed   :  { %v1021_v43 = vmul.f32 %v4014_v42, %v4010_v34  ;;  %v1491_v42 = vld [vmem:[%s4677_s6 + $0x30] sm:$0xff] }
 0x5ef   :  { %3567 = vmatmul.mubr.msk.f32.vlgmr.msra.gmra.mrb[6].mxu0 %vm437_vm5, %v1021_v43  ;;  %v1492_v43 = vld [vmem:[%s4677_s6 + $0x38] sm:$0xff] }
 0x5f0   :  { %v4016_v44 = vpop.eup %4015  ;;  %3851 = vmatpush3.bf16.msra.mxu0 %v3848_v48  ;;  %v1495_v48 = vld [vmem:[%s4677_s6 + $0x50] sm:$0xff] }
 0x5f1   :  { %v1023_v45 = vmul.f32 %v4016_v44, %v4012_v36  ;;  %3853 = vmatprep.subr.bf16.mxu0 %v3852_v51  ;;  %v3876_v44 = vpack.c.bf16 %v1492_v43, %v1491_v42  ;;  %v3884_v50 = vpack.c.bf16 %v1496_v49, %v1495_v48 }
 0x5f3   :  { %3572 = vmatmul.mubr.msk.f32.vlgmr.msra.gmra.mrb[18].mxu1 %vm437_vm5, %v1023_v45  ;;  %v1493_v45 = vld [vmem:[%s4677_s6 + $0x40] sm:$0xff] }
 0x5f4   :  { %v3880_v47 = vpack.c.bf16 %v1494_v46, %v1493_v45 }
 0x6c2   :  { %v1093_v52 = vpop.f32.mrb[6].mxu0 }
 0x6c3   :  { %v3568_v53 = vpop.f32.mrb[7].mxu0  ;;  %3578 = vmatprep.mubr.msk.f32.mxu0 %vm282_vm2, %v1093_v52  ;;  %v1498_v52 = vld [vmem:[%s4677_s6 + $0x68] sm:$0xff] }
 0x6c6   :  { %v1166_v54 = vpop.f32.mrb[18].mxu1 }
 0x6c7   :  { %v3573_v55 = vpop.f32.mrb[19].mxu1  ;;  %3579 = vmatmul.mubr.msk.f32.vlgmr.msra.gmra.mrb[8].mxu0 %vm282_vm2, %v1166_v54  ;;  %v1499_v54 = vld [vmem:[%s4677_s6 + $0x70] sm:$0xff] }
 0x6c8   :  { %3855 = vmatpush3.bf16.msra.mxu0 %v3852_v51  ;;  %3585 = vmatprep.mubr.msk.f32.mxu0 %vm282_vm2, %v4258_v3  ;;  %v1497_v51 = vld [vmem:[%s4677_s6 + $0x60] sm:$0xff]  ;;  %v1500_v55 = vld [vmem:[%s4677_s6 + $0x78] sm:$0xff] }
 0x6c9   :  { %3865 = vmatprep.subr.bf16.mxu0 %v3864_v17  ;;  %v3888_v53 = vpack.c.bf16 %v1498_v52, %v1497_v51 }
 0x6cf   :  { %3586 = vmatmul.mubr.msk.f32.vlgmr.msra.gmra.mrb[8].mxu0 %vm282_vm2, %v4256_v1 }
 0x6d0   :  { %3867 = vmatpush3.bf16.msra.mxu0 %v3864_v17  ;;  %v3213_v17 = vld [vmem:[%s4678_s7 + $0x2] ss:$0 sm:$0xff] }
 0x6d1   :  { %3869 = vmatprep.subr.bf16.mxu0 %v3868_v19 }
 0x6d4   :  { %3871 = vmatpush3.bf16.msra.mxu0 %v3868_v19 }
 0x6d5   :  { %3873 = vmatprep.subr.bf16.mxu0 %v3872_v23 }
 0x6d8   :  { %3875 = vmatpush3.bf16.msra.mxu0 %v3872_v23  ;;  %v3222_v23 = vld [vmem:[%s4673_s2 + $0x110] sm:$0xff] }
 0x6d9   :  { %3877 = vmatprep.subr.bf16.mxu0 %v3876_v44 }
 0x6dc   :  { %3879 = vmatpush3.bf16.msra.mxu0 %v3876_v44 }
 0x6dd   :  { %3881 = vmatprep.subr.bf16.mxu0 %v3880_v47 }
 0x6e0   :  { %3883 = vmatpush3.bf16.msra.mxu0 %v3880_v47 }
 0x6e1   :  { %3885 = vmatprep.subr.bf16.mxu0 %v3884_v50 }
 0x6e4   :  { %3887 = vmatpush3.bf16.msra.mxu0 %v3884_v50 }
 0x6e5   :  { %3889 = vmatprep.subr.bf16.mxu0 %v3888_v53 }
 0x6e8   :  { %3891 = vmatpush3.bf16.msra.mxu0 %v3888_v53 }
 0x7a2   :  { %v3587_v56 = vpop.f32.mrb[8].mxu0 }
 0x7a3   :  { %v1336_v57 = vadd.f32 %v3587_v56, %v4157_v12  ;;  %v1326_v58 = vpop.f32.mrb[9].mxu0  ;;  %v3892_v56 = vpack.c.bf16 %v1500_v55, %v1499_v54 }
 0x7a4   :  { %v1335_v59 = vadd.f32 %v1326_v58, %v4138_v5  ;;  %v1383_v5 = vld [vmem:[%s4675_s4] sm:$0xff]  ;;  %v3215_v58 = vld [vmem:[%s4673_s2 + $0xc8] sm:$0xff] }
 0x7a5   :  { %v1340_v60 = vsel %vm40_vm0, %v1336_v57, 0.0  ;;  %v3856_v9 = vpack.c.bf16 %v1384_v8, %v1383_v5  ;;  %3893 = vmatprep.subr.bf16.mxu0 %v3892_v56 }
 0x7a6   :  { %1341 = vadd.xlane.f32.xlu1 %v1340_v60  ;;  %v1337_v61 = vsel %vm40_vm0, %v1335_v59, 0.0  ;;  %3895 = vmatpush3.bf16.msra.mxu0 %v3892_v56  ;;  %v3209_v60 = vld [vmem:[%s4676_s5] ss:$0 sm:$0xff] }
 0x7a7   :  { %1338 = vadd.xlane.f32.xlu0 %v1337_v61  ;;  %3857 = vmatprep.subr.bf16.mxu1 %v3856_v9 }
 0x7a8   :  { %3859 = vmatpush3.bf16.msra.mxu1 %v3856_v9  ;;  %3677 = vmatprep.subr.mxu0 %v4073_v20 }
 0x7a9   :  { %3861 = vmatprep.subr.bf16.mxu1 %v3860_v13 }
 0x7ac   :  { %3863 = vmatpush3.bf16.msra.mxu1 %v3860_v13  ;;  %v3900_v13 = vpack.c.bf16 %v3217_v11, %v3216_v10  ;;  %v3252_v10 = vld [vmem:[%s4673_s2 + $0x160] sm:$0xff]  ;;  %v3253_v11 = vld [vmem:[%s4673_s2 + $0x168] sm:$0xff] }
 0x833   :  { %v1342_v62 = vpop.xlane.xlu1 %1341 }
 0x834   :  { %v1345_v63 = vmul.f32 0.03125, %v1342_v62  ;;  %v1339_v0 = vpop.xlane.xlu0 %1338 }
 0x835   :  { %v1344_v2 = vmul.f32 0.03125, %v1339_v0 }
 0x836   :  { %v1347_v3 = vsub.f32 %v1336_v57, %v1345_v63  ;;  %v3214_v57 = vld [vmem:[%s4673_s2 + $0xc0] sm:$0xff] }
 0x837   :  { %v1346_v4 = vsub.f32 %v1335_v59, %v1344_v2  ;;  %v3896_v59 = vpack.c.bf16 %v3215_v58, %v3214_v57 }
 0x838   :  { %v1349_v6 = vmul.f32 %v1347_v3, %v1347_v3 }
 0x839   :  { %v1348_v1 = vmul.f32 %v1346_v4, %v1346_v4  ;;  %3897 = vmatprep.subr.bf16.mxu1 %v3896_v59 }
 0x83a   :  { %v1353_v7 = vsel %vm40_vm0, %v1349_v6, 0.0 }
 0x83b   :  { %1354 = vadd.xlane.f32.xlu1 %v1353_v7  ;;  %v1350_v12 = vsel %vm40_vm0, %v1348_v1, 0.0 }
 0x83c   :  { %1351 = vadd.xlane.f32.xlu0 %v1350_v12 }
 0x8c8   :  { %v1355_v24 = vpop.xlane.xlu1 %1354 }
 0x8c9   :  { %v1357_v25 = vmul.f32 0.03125, %v1355_v24  ;;  %v1352_v26 = vpop.xlane.xlu0 %1351  ;;  %v3223_v24 = vld [vmem:[%s4673_s2 + $0x118] sm:$0xff] }
 0x8ca   :  { %v1356_v28 = vmul.f32 0.03125, %v1352_v26 }
 0x8cb   :  { %v1359_v30 = vadd.f32 1e-06, %v1357_v25 }
 0x8cc   :  { %v1358_v31 = vadd.f32 1e-06, %v1356_v28  ;;  %v3908_v28 = vpack.c.bf16 %v3223_v24, %v3222_v23 }
 0x8cd   :  { %4017 = vrsqrt.f32 %v1359_v30  ;;  %v3226_v30 = vld [vmem:[%s4673_s2 + $0x140] sm:$0xff] }
 0x8ce   :  { %4019 = vrsqrt.f32 %v1358_v31  ;;  %v3227_v31 = vld [vmem:[%s4673_s2 + $0x148] sm:$0xff] }
 0x8d7   :  { %v4018_v32 = vpop.eup %4017 }
 0x8d8   :  { %v4020_v34 = vpop.eup %4019  ;;  %v1363_v35 = vmul.f32 %v4018_v32, %v1347_v3  ;;  %v3912_v32 = vpack.c.bf16 %v3227_v31, %v3226_v30 }
 0x8d9   :  { %v1362_v36 = vmul.f32 %v4020_v34, %v1346_v4  ;;  %v3229_v34 = vld [vmem:[%s4673_s2 + $0x158] sm:$0xff] }
 0x8da   :  { %v1372_v37 = vmul.f32 %v3206_v33, %v1363_v35 }
 0x8db   :  { %v1371_v39 = vmul.f32 %v3206_v33, %v1362_v36  ;;  %v3228_v33 = vld [vmem:[%s4673_s2 + $0x150] sm:$0xff] }
 0x8dc   :  { %v4359_v41 = vadd.f32 %v3208_v38, %v1372_v37  ;;  %v3916_v35 = vpack.c.bf16 %v3229_v34, %v3228_v33 }
 0x8dd   :  { %v4357_v40 = vadd.f32 %v3208_v38, %v1371_v39 }
 0x8df   :  { %3596 = vmatprep.mubr.msk.f32.mxu1 %vm40_vm0, %v4357_v40 }
 0x8e0   :  { %3597 = vmatmul.mubr.msk.f32.vlgmr.msra.gmra.mrb[20].mxu1 %vm40_vm0, %v4359_v41 }
 0x8e1   :  { %3899 = vmatpush3.bf16.msra.mxu1 %v3896_v59 }
 0x8e2   :  { %3901 = vmatprep.subr.bf16.mxu1 %v3900_v13 }
 0x8e5   :  { %3903 = vmatpush3.bf16.msra.mxu1 %v3900_v13 }
 0x8e6   :  { %3905 = vmatprep.subr.bf16.mxu1 %v3904_v16 }
 0x9b3   :  { %v3598_v61 = vpop.f32.mrb[20].mxu1 }
 0x9b4   :  { %v1472_v62 = vadd.f32 %v3598_v61, %v3209_v60  ;;  %v1466_v63 = vpop.f32.mrb[21].mxu1  ;;  %v3241_v61 = vld [vmem:[%s4673_s2 + $0xe8] sm:$0xff] }
 0x9b5   :  { %v1467_v0 = vadd.f32 %v3209_v60, %v1466_v63  ;;  %v3240_v60 = vld [vmem:[%s4673_s2 + $0xe0] sm:$0xff] }
 0x9b6   :  { %v1478_v2 = vmul.f32 0.70710677, %v1472_v62  ;;  %v1476_v5 = vmul.f32 0.5, %v1472_v62  ;;  %v3920_v62 = vpack.c.bf16 %v3241_v61, %v3240_v60  ;;  %v3246_v63 = vld [vmem:[%s4673_s2 + $0x120] sm:$0xff]  ;;  %v3239_v60 = vld [vmem:[%s4674_s3 + $0x28] sm:$0xff] }
 0x9b7   :  { %v1477_v3 = vmul.f32 0.70710677, %v1467_v0  ;;  %v1475_v7 = vmul.f32 0.5, %v1467_v0  ;;  %v3247_v0 = vld [vmem:[%s4673_s2 + $0x128] sm:$0xff] }
 0x9b8   :  { %4021 = verf.f32 %v1478_v2  ;;  %v3928_v2 = vpack.c.bf16 %v3247_v0, %v3246_v63 }
 0x9b9   :  { %4023 = verf.f32 %v1477_v3 }
 0x9c2   :  { %v4022_v4 = vpop.eup %4021 }
 0x9c3   :  { %v4024_v6 = vpop.eup %4023  ;;  %v1482_v1 = vadd.f32 1.0, %v4022_v4 }
 0x9c4   :  { %v1481_v12 = vadd.f32 1.0, %v4024_v6  ;;  %v3242_v6 = vld [vmem:[%s4673_s2 + $0xf0] sm:$0xff] }
 0x9c5   :  { %v1484_v9 = vmul.f32 %v1482_v1, %v1476_v5  ;;  %v3243_v1 = vld [vmem:[%s4673_s2 + $0xf8] sm:$0xff] }
 0x9c6   :  { %v1483_v8 = vmul.f32 %v1481_v12, %v1475_v7  ;;  %v3924_v5 = vpack.c.bf16 %v3243_v1, %v3242_v6 }
 0x9c8   :  { %3631 = vmatprep.mubr.f32.mxu0 %v1483_v8  ;;  %v3248_v8 = vld [vmem:[%s4673_s2 + $0x130] sm:$0xff] }
 0x9c9   :  { %3632 = vmatmul.mubr.f32.vlgmr.msra.gmra.mrb[10].mxu0 %v1484_v9  ;;  %v3249_v9 = vld [vmem:[%s4673_s2 + $0x138] sm:$0xff] }
 0x9ca   :  { %3679 = vmatprep.mubr.msk.f32.mxu0 %vm4074_vm1, %v4073_v20  ;;  %v3932_v15 = vpack.c.bf16 %v3249_v9, %v3248_v8 }
 0xa9c   :  { %v3633_v18 = vpop.f32.mrb[10].mxu0 }
 0xa9d   :  { %v1581_v19 = vadd.f32 %v3633_v18, %v3213_v17  ;;  %v1575_v21 = vpop.f32.mrb[11].mxu0  ;;  %v3255_v18 = vld [vmem:[%s4673_s2 + $0x178] sm:$0xff] }
 0xa9e   :  { %v1576_v22 = vadd.f32 %v3213_v17, %v1575_v21  ;;  %v3254_v17 = vld [vmem:[%s4673_s2 + $0x170] sm:$0xff]  ;;  %s4075_s2 = smov [#allocation2]  }
 0xa9f   :  { %v4432_v26 = vadd.f32 %v1581_v19, %v4359_v41  ;;  %v3940_v19 = vpack.c.bf16 %v3255_v18, %v3254_v17  ;;  %v3275_v17 = vld [vmem:[%s4675_s4 + $0x28] sm:$0xff]  ;;  %s3145_s21 = sshll.u32 %s4075_s2, 4  ;;  %s3146_s21 = int_to_ptr.vmem [resolvable:$true] %s3145_s21 }
 0xaa0   :  { %v4429_v25 = vadd.f32 %v1576_v22, %v4357_v40  ;;  %s4049_s22 = scalar_lea.vmem %s3146_s21, 256  ;;  %p4054_p1 = scmp.lt.s32.totalorder %s3146_s21, %s3146_s21 }
 0xaa1   :  { %p4050_p0 = scmp.ne.s32.totalorder %s3146_s21, %s4049_s22  ;;  %p4055_p2 = scmp.lt.s32.totalorder %s4049_s22, %s4049_s22 }
 0xaa2   :  { %3642 = vmatprep.mubr.msk.f32.mxu1 %vm40_vm0, %v4429_v25 }
 0xaa3   :  { %3643 = vmatmul.mubr.msk.f32.vlgmr.msra.gmra.mrb[22].mxu1 %vm40_vm0, %v4432_v26  ;;  %p4056_p3 = por %p4055_p2, %p4054_p1 }
 0xaa4   :  { %3907 = vmatpush3.bf16.msra.mxu1 %v3904_v16  ;;  %3653 = vmatprep.mubr.msk.f32.mxu1 %vm40_vm0, %v4429_v25  ;;  %v3936_v16 = vpack.c.bf16 %v3253_v11, %v3252_v10 }
 0xaa5   :  { %3909 = vmatprep.subr.bf16.mxu1 %v3908_v28  ;;  %p4057_p4 = pnand %p4056_p3, %p4050_p0 }
 0xaa8   :  { %3911 = vmatpush3.bf16.msra.mxu1 %v3908_v28 }
 0xaa9   :  { %3913 = vmatprep.subr.bf16.mxu1 %v3912_v32 }
 0xaab   :  { %3654 = vmatmul.mubr.msk.f32.vlgmr.msra.gmra.mrb[24].mxu1 %vm40_vm0, %v4432_v26 }
 0xaac   :  { %3915 = vmatpush3.bf16.msra.mxu1 %v3912_v32  ;;  %3664 = vmatprep.mubr.msk.f32.mxu1 %vm40_vm0, %v4429_v25 }
 0xaad   :  { %3917 = vmatprep.subr.bf16.mxu1 %v3916_v35 }
 0xab0   :  { %3919 = vmatpush3.bf16.msra.mxu1 %v3916_v35 }
 0xab1   :  { %3667 = vmatprep.subr.mxu1 %v4073_v20 }
 0xab3   :  { %3665 = vmatmul.mubr.msk.f32.vlgmr.msra.gmra.mrb[26].mxu1 %vm40_vm0, %v4432_v26 }
 0xab4   :  { %3669 = vmatprep.mubr.msk.f32.mxu1 %vm4074_vm1, %v4073_v20 }
 0xb76   :  { %v3644_v36 = vpop.f32.mrb[22].mxu1 }
 0xb77   :  { %v1663_v37 = vpop.f32.mrb[23].mxu1 }
 0xb7e   :  { %v3655_v38 = vpop.f32.mrb[24].mxu1 }
 0xb7f   :  { %v1743_v39 = vpop.f32.mrb[25].mxu1 }
 0xb80   :  { %3668 = vmatpush3.xpose.msk.msra.mxu1 %vm282_vm2, %v1743_v39 }
 0xb81   :  { %3672 = vmatprep.subr.mxu1 %v4073_v20 }
 0xb83   :  { %3670 = vmatmul.mubr.msk.f32.vlgmr.msra.gmra.mrb[28].mxu1 %vm282_vm2, %v1663_v37 }
 0xb84   :  { %3673 = vmatpush3.xpose.msk.msra.mxu1 %vm282_vm2, %v3655_v38  ;;  %3674 = vmatprep.mubr.msk.f32.mxu1 %vm4074_vm1, %v4073_v20 }
 0xb85   :  { %3682 = vmatprep.subr.mxu1 %v4073_v20 }
 0xb86   :  { %v3666_v40 = vpop.f32.mrb[26].mxu1 }
 0xb87   :  { %v1823_v41 = vpop.f32.mrb[27].mxu1  ;;  %3675 = vmatmul.mubr.msk.f32.vlgmr.msra.gmra.mrb[30].mxu1 %vm282_vm2, %v3644_v36 }
 0xb88   :  { %3678 = vmatpush3.msra.mxu0 %v1823_v41  ;;  %3683 = vmatpush3.msra.mxu1 %v3666_v40 }
 0xb89   :  { %3684 = vmatprep.mubr.msk.f32.mxu1 %vm4074_vm1, %v4073_v20  ;;  %3921 = vmatprep.subr.bf16.mxu0 %v3920_v62 }
 0xb8a   :  { %3929 = vmatprep.subr.bf16.mxu1 %v3928_v2 }
 0xc56   :  { %v1904_v42 = vpop.f32.mrb[28].mxu1 }
 0xc57   :  { %v1984_v43 = vsel %vm34_vm4, %v1904_v42, -1e+12  ;;  %v3671_v44 = vpop.f32.mrb[29].mxu1 }
 0xc58   :  { %v1986_v45 = vsel %vm437_vm5, %v1984_v43, -inf }
 0xc59   :  { %1987 = vmax.xlane.f32.xlu1 %v1986_v45 }
 0xc5a   :  { %v1980_v46 = vpop.f32.mrb[30].mxu1 }
 0xc5b   :  { %v1985_v47 = vsel %vm35_vm3, %v1980_v46, -1e+12  ;;  %v3676_v48 = vpop.f32.mrb[31].mxu1 }
 0xc5c   :  { %v1989_v49 = vsel %vm437_vm5, %v1985_v47, -inf }
 0xc5d   :  { %1990 = vmax.xlane.f32.xlu0 %v1989_v49 }
 0xce6   :  { %v1988_v50 = vpop.xlane.xlu1 %1987 }
 0xce7   :  { %v1992_v51 = vsub.f32 %v1984_v43, %v1988_v50 }
 0xce9   :  { %v1994_v52 = vmul.f32 1.442695, %v1992_v51 }
 0xcea   :  { %v1991_v53 = vpop.xlane.xlu0 %1990 }
 0xceb   :  { %4025 = vpow2.f32 %v1994_v52  ;;  %v1993_v54 = vsub.f32 %v1985_v47, %v1991_v53 }
 0xced   :  { %v1996_v55 = vmul.f32 1.442695, %v1993_v54 }
 0xcef   :  { %4027 = vpow2.f32 %v1996_v55 }
 0xcf5   :  { %v4026_v56 = vpop.eup %4025 }
 0xcf6   :  { %v1998_v57 = vsel %vm437_vm5, %v4026_v56, 0.0 }
 0xcf7   :  { %1999 = vadd.xlane.f32.xlu1 %v1998_v57  ;;  %v3265_v57 = vld [vmem:[%s4674_s3 + $0x38] sm:$0xff] }
 0xcf9   :  { %v4028_v58 = vpop.eup %4027 }
 0xcfa   :  { %v2001_v59 = vsel %vm437_vm5, %v4028_v58, 0.0 }
 0xcfb   :  { %2002 = vadd.xlane.f32.xlu0 %v2001_v59  ;;  %v3238_v59 = vld [vmem:[%s4674_s3 + $0x20] sm:$0xff] }
 0xcfc   :  { %v3948_v61 = vpack.c.bf16 %v3239_v60, %v3238_v59  ;;  %v3295_v59 = vld [vmem:[%s4677_s6 + $0xe8] sm:$0xff] }
 0xd84   :  { %v2000_v3 = vpop.xlane.xlu1 %1999 }
 0xd85   :  { %4029 = vrcp.f32 %v2000_v3 }
 0xd88   :  { %v2003_v4 = vpop.xlane.xlu0 %2002 }
 0xd89   :  { %4031 = vrcp.f32 %v2003_v4 }
 0xd8f   :  { %v4030_v7 = vpop.eup %4029 }
 0xd90   :  { %v2005_v12 = vmul.f32 %v4030_v7, %v4026_v56  ;;  %v3264_v56 = vld [vmem:[%s4674_s3 + $0x30] sm:$0xff] }
 0xd92   :  { %3680 = vmatmul.mubr.msk.f32.vlgmr.msra.gmra.mrb[12].mxu0 %vm437_vm5, %v2005_v12 }
 0xd93   :  { %v4032_v13 = vpop.eup %4031  ;;  %3923 = vmatpush3.bf16.msra.mxu0 %v3920_v62  ;;  %3695 = vmatprep.mubr.msk.f32.mxu0 %vm40_vm0, %v4429_v25 }
 0xd94   :  { %v2007_v14 = vmul.f32 %v4032_v13, %v4028_v58  ;;  %3925 = vmatprep.subr.bf16.mxu0 %v3924_v5  ;;  %v3944_v58 = vpack.c.bf16 %v3265_v57, %v3264_v56  ;;  %v3293_v56 = vld [vmem:[%s4677_s6 + $0xd8] sm:$0xff] }
 0xd96   :  { %3685 = vmatmul.mubr.msk.f32.vlgmr.msra.gmra.mrb[32].mxu1 %vm437_vm5, %v2007_v14 }
 0xd97   :  { %3927 = vmatpush3.bf16.msra.mxu0 %v3924_v5  ;;  %3931 = vmatpush3.bf16.msra.mxu1 %v3928_v2 }
 0xd98   :  { %3706 = vmatprep.mubr.msk.f32.mxu1 %vm40_vm0, %v4429_v25  ;;  %3933 = vmatprep.subr.bf16.mxu1 %v3932_v15 }
 0xd99   :  { %3937 = vmatprep.subr.bf16.mxu0 %v3936_v16 }
 0xd9a   :  { %3696 = vmatmul.mubr.msk.f32.vlgmr.msra.gmra.mrb[14].mxu0 %vm40_vm0, %v4432_v26 }
 0xd9b   :  { %3935 = vmatpush3.bf16.msra.mxu1 %v3932_v15  ;;  %3939 = vmatpush3.bf16.msra.mxu0 %v3936_v16 }
 0xd9c   :  { %3717 = vmatprep.mubr.msk.f32.mxu0 %vm40_vm0, %v4429_v25  ;;  %3941 = vmatprep.subr.bf16.mxu0 %v3940_v19 }
 0xd9d   :  { %3720 = vmatprep.subr.mxu1 %v4073_v20 }
 0xd9e   :  { %3707 = vmatmul.mubr.msk.f32.vlgmr.msra.gmra.mrb[34].mxu1 %vm40_vm0, %v4432_v26 }
 0xd9f   :  { %3943 = vmatpush3.bf16.msra.mxu0 %v3940_v19  ;;  %3722 = vmatprep.mubr.msk.f32.mxu1 %vm4074_vm1, %v4073_v20  ;;  %v3276_v19 = vld [vmem:[%s4675_s4 + $0x30] sm:$0xff] }
 0xda0   :  { %3730 = vmatprep.subr.mxu0 %v4073_v20 }
 0xda2   :  { %3718 = vmatmul.mubr.msk.f32.vlgmr.msra.gmra.mrb[16].mxu0 %vm40_vm0, %v4432_v26 }
 0xda3   :  { %3732 = vmatprep.mubr.msk.f32.mxu0 %vm4074_vm1, %v4073_v20 }
 0xe65   :  { %v4535_v21 = vpop.f32.mrb[12].mxu0 }
 0xe66   :  { %v3681_v22 = vpop.f32.mrb[13].mxu0 }
 0xe69   :  { %v4537_v23 = vpop.f32.mrb[32].mxu1 }
 0xe6a   :  { %v3686_v24 = vpop.f32.mrb[33].mxu1 }
 0xe6b   :  { %v3283_v24 = vld [vmem:[%s4677_s6 + $0x88] sm:$0xff] }
 0xe6d   :  { %v3697_v28 = vpop.f32.mrb[14].mxu0 }
 0xe6e   :  { %v2228_v30 = vpop.f32.mrb[15].mxu0 }
 0xe71   :  { %v3708_v31 = vpop.f32.mrb[34].mxu1 }
 0xe72   :  { %v2308_v32 = vpop.f32.mrb[35].mxu1 }
 0xe73   :  { %3721 = vmatpush3.xpose.msk.msra.mxu1 %vm282_vm2, %v2308_v32 }
 0xe74   :  { %3725 = vmatprep.subr.mxu1 %v4073_v20 }
 0xe75   :  { %v3719_v33 = vpop.f32.mrb[16].mxu0 }
 0xe76   :  { %v2388_v34 = vpop.f32.mrb[17].mxu0  ;;  %3723 = vmatmul.mubr.msk.f32.vlgmr.msra.gmra.mrb[36].mxu1 %vm282_vm2, %v2228_v30 }
 0xe77   :  { %3726 = vmatpush3.xpose.msk.msra.mxu1 %vm282_vm2, %v3708_v31  ;;  %3731 = vmatpush3.msra.mxu0 %v2388_v34  ;;  %v3285_v31 = vld [vmem:[%s4677_s6 + $0x98] sm:$0xff]  ;;  %v3287_v34 = vld [vmem:[%s4677_s6 + $0xa8] sm:$0xff] }
 0xe78   :  { %3727 = vmatprep.mubr.msk.f32.mxu1 %vm4074_vm1, %v4073_v20  ;;  %3735 = vmatprep.subr.mxu1 %v4073_v20 }
 0xe79   :  { %3945 = vmatprep.subr.bf16.mxu0 %v3944_v58 }
 0xe7a   :  { %3728 = vmatmul.mubr.msk.f32.vlgmr.msra.gmra.mrb[38].mxu1 %vm282_vm2, %v3697_v28  ;;  %v3284_v28 = vld [vmem:[%s4677_s6 + $0x90] sm:$0xff] }
 0xe7b   :  { %3736 = vmatpush3.msra.mxu1 %v3719_v33  ;;  %3737 = vmatprep.mubr.msk.f32.mxu1 %vm4074_vm1, %v4073_v20  ;;  %v3964_v32 = vpack.c.bf16 %v3285_v31, %v3284_v28  ;;  %v3286_v33 = vld [vmem:[%s4677_s6 + $0xa0] sm:$0xff] }
 0xf49   :  { %v2469_v35 = vpop.f32.mrb[36].mxu1 }
 0xf4a   :  { %v2549_v36 = vsel %vm34_vm4, %v2469_v35, -1e+12  ;;  %v3724_v37 = vpop.f32.mrb[37].mxu1  ;;  %v3968_v35 = vpack.c.bf16 %v3287_v34, %v3286_v33 }
 0xf4b   :  { %v2551_v38 = vsel %vm437_vm5, %v2549_v36, -inf }
 0xf4c   :  { %2552 = vmax.xlane.f32.xlu0 %v2551_v38 }
 0xf4d   :  { %v2545_v39 = vpop.f32.mrb[38].mxu1 }
 0xf4e   :  { %v2550_v40 = vsel %vm35_vm3, %v2545_v39, -1e+12  ;;  %v3729_v41 = vpop.f32.mrb[39].mxu1 }
 0xf4f   :  { %v2554_v42 = vsel %vm437_vm5, %v2550_v40, -inf }
 0xf50   :  { %2555 = vmax.xlane.f32.xlu1 %v2554_v42 }
 0xfd9   :  { %v2553_v43 = vpop.xlane.xlu0 %2552 }
 0xfda   :  { %v2557_v44 = vsub.f32 %v2549_v36, %v2553_v43  ;;  %v3271_v43 = vld [vmem:[%s4678_s7 + $0x3] ss:$0 sm:$0xff] }
 0xfdc   :  { %v2559_v45 = vmul.f32 1.442695, %v2557_v44 }
 0xfdd   :  { %v2556_v20 = vpop.xlane.xlu1 %2555 }
 0xfde   :  { %4033 = vpow2.f32 %v2559_v45  ;;  %v2558_v46 = vsub.f32 %v2550_v40, %v2556_v20 }
 0xfe0   :  { %v2561_v29 = vmul.f32 1.442695, %v2558_v46 }
 0xfe2   :  { %4035 = vpow2.f32 %v2561_v29  ;;  %v3273_v29 = vld [vmem:[%s4678_s7 + $0x4] ss:$0 sm:$0xff] }
 0xfe8   :  { %v4034_v47 = vpop.eup %4033 }
 0xfe9   :  { %v2563_v48 = vsel %vm437_vm5, %v4034_v47, 0.0 }
 0xfea   :  { %2564 = vadd.xlane.f32.xlu0 %v2563_v48 }
 0xfec   :  { %v4036_v49 = vpop.eup %4035 }
 0xfed   :  { %v2566_v27 = vsel %vm437_vm5, %v4036_v49, 0.0 }
 0xfee   :  { %2567 = vadd.xlane.f32.xlu1 %v2566_v27  ;;  %v3288_v27 = vld [vmem:[%s4677_s6 + $0xb0] sm:$0xff] }
0x1077   :  { %v2565_v50 = vpop.xlane.xlu0 %2564 }
0x1078   :  { %4037 = vrcp.f32 %v2565_v50  ;;  %v3289_v50 = vld [vmem:[%s4677_s6 + $0xb8] sm:$0xff] }
0x107b   :  { %v2568_v51 = vpop.xlane.xlu1 %2567 }
0x107c   :  { %4039 = vrcp.f32 %v2568_v51  ;;  %v3972_v51 = vpack.c.bf16 %v3289_v50, %v3288_v27 }
0x1082   :  { %v4038_v52 = vpop.eup %4037 }
0x1083   :  { %v2570_v53 = vmul.f32 %v4038_v52, %v4034_v47  ;;  %v3290_v52 = vld [vmem:[%s4677_s6 + $0xc0] sm:$0xff] }
0x1085   :  { %3733 = vmatmul.mubr.msk.f32.vlgmr.msra.gmra.mrb[18].mxu0 %vm437_vm5, %v2570_v53  ;;  %v3291_v53 = vld [vmem:[%s4677_s6 + $0xc8] sm:$0xff] }
0x1086   :  { %v4040_v54 = vpop.eup %4039  ;;  %3947 = vmatpush3.bf16.msra.mxu0 %v3944_v58  ;;  %v3294_v58 = vld [vmem:[%s4677_s6 + $0xe0] sm:$0xff] }
0x1087   :  { %v2572_v55 = vmul.f32 %v4040_v54, %v4036_v49  ;;  %3949 = vmatprep.subr.bf16.mxu0 %v3948_v61  ;;  %v3976_v54 = vpack.c.bf16 %v3291_v53, %v3290_v52  ;;  %v3984_v60 = vpack.c.bf16 %v3295_v59, %v3294_v58 }
0x1089   :  { %3738 = vmatmul.mubr.msk.f32.vlgmr.msra.gmra.mrb[40].mxu1 %vm437_vm5, %v2572_v55  ;;  %v3292_v55 = vld [vmem:[%s4677_s6 + $0xd0] sm:$0xff] }
0x108a   :  { %v3980_v57 = vpack.c.bf16 %v3293_v56, %v3292_v55 }
0x1158   :  { %v2642_v62 = vpop.f32.mrb[18].mxu0 }
0x1159   :  { %v3734_v63 = vpop.f32.mrb[19].mxu0  ;;  %3744 = vmatprep.mubr.msk.f32.mxu0 %vm282_vm2, %v2642_v62  ;;  %v3297_v62 = vld [vmem:[%s4677_s6 + $0xf8] sm:$0xff] }
0x115c   :  { %v2715_v0 = vpop.f32.mrb[40].mxu1 }
0x115d   :  { %v3739_v2 = vpop.f32.mrb[41].mxu1  ;;  %3745 = vmatmul.mubr.msk.f32.vlgmr.msra.gmra.mrb[20].mxu0 %vm282_vm2, %v2715_v0  ;;  %v3279_v0 = vld [vmem:[%s4676_s5 + $0x1] ss:$0 sm:$0xff] }
0x115e   :  { %3951 = vmatpush3.bf16.msra.mxu0 %v3948_v61  ;;  %3751 = vmatprep.mubr.msk.f32.mxu0 %vm282_vm2, %v4535_v21  ;;  %v3277_v21 = vld [vmem:[%s4675_s4 + $0x38] sm:$0xff]  ;;  %v3296_v61 = vld [vmem:[%s4677_s6 + $0xf0] sm:$0xff] }
0x115f   :  { %v3956_v22 = vpack.c.bf16 %v3277_v21, %v3276_v19  ;;  %v3988_v63 = vpack.c.bf16 %v3297_v62, %v3296_v61 }
0x1165   :  { %3752 = vmatmul.mubr.msk.f32.vlgmr.msra.gmra.mrb[20].mxu0 %vm282_vm2, %v4537_v23  ;;  %v3282_v23 = vld [vmem:[%s4677_s6 + $0x80] sm:$0xff] }
0x1166   :  { %v3960_v30 = vpack.c.bf16 %v3283_v24, %v3282_v23 }
0x1168   :  { %3961 = vmatprep.subr.bf16.mxu0 %v3960_v30 }
0x1169   :  { %3963 = vmatpush3.bf16.msra.mxu0 %v3960_v30 }
0x116a   :  { %3965 = vmatprep.subr.bf16.mxu0 %v3964_v32 }
0x116d   :  { %3967 = vmatpush3.bf16.msra.mxu0 %v3964_v32 }
0x116e   :  { %3969 = vmatprep.subr.bf16.mxu0 %v3968_v35 }
0x1171   :  { %3971 = vmatpush3.bf16.msra.mxu0 %v3968_v35 }
0x1172   :  { %3973 = vmatprep.subr.bf16.mxu0 %v3972_v51 }
0x1175   :  { %3975 = vmatpush3.bf16.msra.mxu0 %v3972_v51 }
0x1176   :  { %3977 = vmatprep.subr.bf16.mxu0 %v3976_v54 }
0x1179   :  { %3979 = vmatpush3.bf16.msra.mxu0 %v3976_v54 }
0x117a   :  { %3981 = vmatprep.subr.bf16.mxu0 %v3980_v57 }
0x117d   :  { %3983 = vmatpush3.bf16.msra.mxu0 %v3980_v57 }
0x117e   :  { %3985 = vmatprep.subr.bf16.mxu0 %v3984_v60 }
0x1181   :  { %3987 = vmatpush3.bf16.msra.mxu0 %v3984_v60 }
0x1182   :  { %3989 = vmatprep.subr.bf16.mxu0 %v3988_v63 }
0x1185   :  { %3991 = vmatpush3.bf16.msra.mxu0 %v3988_v63 }
0x1238   :  { %v3753_v3 = vpop.f32.mrb[20].mxu0 }
0x1239   :  { %v2885_v4 = vadd.f32 %v3753_v3, %v4432_v26  ;;  %v2875_v6 = vpop.f32.mrb[21].mxu0 }
0x123a   :  { %v2884_v1 = vadd.f32 %v2875_v6, %v4429_v25  ;;  %v3274_v25 = vld [vmem:[%s4675_s4 + $0x20] sm:$0xff] }
0x123b   :  { %v2889_v7 = vsel %vm40_vm0, %v2885_v4, 0.0  ;;  %v3952_v18 = vpack.c.bf16 %v3275_v17, %v3274_v25 }
0x123c   :  { %2890 = vadd.xlane.f32.xlu1 %v2889_v7  ;;  %v2886_v12 = vsel %vm40_vm0, %v2884_v1, 0.0 }
0x123d   :  { %2887 = vadd.xlane.f32.xlu0 %v2886_v12  ;;  %3953 = vmatprep.subr.bf16.mxu1 %v3952_v18 }
0x123e   :  { %3955 = vmatpush3.bf16.msra.mxu1 %v3952_v18 }
0x123f   :  { %3957 = vmatprep.subr.bf16.mxu1 %v3956_v22 }
0x1242   :  { %3959 = vmatpush3.bf16.msra.mxu1 %v3956_v22 }
0x12c9   :  { %v2891_v5 = vpop.xlane.xlu1 %2890 }
0x12ca   :  { %v2893_v8 = vmul.f32 0.03125, %v2891_v5  ;;  %v2888_v9 = vpop.xlane.xlu0 %2887 }
0x12cb   :  { %v2892_v10 = vmul.f32 0.03125, %v2888_v9 }
0x12cc   :  { %v2895_v11 = vsub.f32 %v2885_v4, %v2893_v8 }
0x12cd   :  { %v2894_v13 = vsub.f32 %v2884_v1, %v2892_v10 }
0x12ce   :  { %v2897_v14 = vmul.f32 %v2895_v11, %v2895_v11 }
0x12cf   :  { %v2896_v15 = vmul.f32 %v2894_v13, %v2894_v13 }
0x12d0   :  { %v2901_v16 = vsel %vm40_vm0, %v2897_v14, 0.0 }
0x12d1   :  { %2902 = vadd.xlane.f32.xlu1 %v2901_v16  ;;  %v2898_v26 = vsel %vm40_vm0, %v2896_v15, 0.0  ;;  %v3299_v15 = vld [vmem:[%s4678_s7 + $0x5] ss:$0 sm:$0xff] }
0x12d2   :  { %2899 = vadd.xlane.f32.xlu0 %v2898_v26 }
0x135e   :  { %v2903_v36 = vpop.xlane.xlu1 %2902 }
0x135f   :  { %v2905_v37 = vmul.f32 0.03125, %v2903_v36  ;;  %v2900_v38 = vpop.xlane.xlu0 %2899 }
0x1360   :  { %v2904_v39 = vmul.f32 0.03125, %v2900_v38 }
0x1361   :  { %v2907_v40 = vadd.f32 1e-06, %v2905_v37 }
0x1362   :  { %v2906_v41 = vadd.f32 1e-06, %v2904_v39 }
0x1363   :  { %4041 = vrsqrt.f32 %v2907_v40 }
0x1364   :  { %4043 = vrsqrt.f32 %v2906_v41 }
0x136d   :  { %v4042_v42 = vpop.eup %4041 }
0x136e   :  { %v4044_v44 = vpop.eup %4043  ;;  %v2911_v45 = vmul.f32 %v4042_v42, %v2895_v11 }
0x136f   :  { %v2910_v20 = vmul.f32 %v4044_v44, %v2894_v13 }
0x1370   :  { %v2921_v46 = vmul.f32 %v3271_v43, %v2911_v45 }
0x1371   :  { %v2920_v47 = vmul.f32 %v3271_v43, %v2910_v20 }
0x1372   :  { %v2931_v49 = vadd.f32 %v3273_v29, %v2921_v46 }
0x1373   :  { %v2930_v48 = vadd.f32 %v3273_v29, %v2920_v47 }
0x1375   :  { %3762 = vmatprep.mubr.msk.f32.mxu1 %vm40_vm0, %v2930_v48 }
0x1376   :  { %3763 = vmatmul.mubr.msk.f32.vlgmr.msra.gmra.mrb[42].mxu1 %vm40_vm0, %v2931_v49 }
0x1449   :  { %v3764_v2 = vpop.f32.mrb[42].mxu1 }
0x144a   :  { %v3023_v3 = vadd.f32 %v3764_v2, %v3279_v0  ;;  %v3017_v4 = vpop.f32.mrb[43].mxu1 }
0x144b   :  { %v3018_v6 = vadd.f32 %v3279_v0, %v3017_v4 }
0x144c   :  { %v3029_v1 = vmul.f32 0.70710677, %v3023_v3  ;;  %v3027_v11 = vmul.f32 0.5, %v3023_v3 }
0x144d   :  { %v3028_v7 = vmul.f32 0.70710677, %v3018_v6  ;;  %v3026_v9 = vmul.f32 0.5, %v3018_v6 }
0x144e   :  { %4045 = verf.f32 %v3029_v1 }
0x144f   :  { %4047 = verf.f32 %v3028_v7 }
0x1458   :  { %v4046_v12 = vpop.eup %4045 }
0x1459   :  { %v4048_v5 = vpop.eup %4047  ;;  %v3033_v8 = vadd.f32 1.0, %v4046_v12 }
0x145a   :  { %v3032_v10 = vadd.f32 1.0, %v4048_v5 }
0x145b   :  { %v3035_v14 = vmul.f32 %v3033_v8, %v3027_v11 }
0x145c   :  { %v3034_v13 = vmul.f32 %v3032_v10, %v3026_v9 }
0x145e   :  { %3797 = vmatprep.mubr.f32.mxu0 %v3034_v13 }
0x145f   :  { %3798 = vmatmul.mubr.f32.vlgmr.msra.gmra.mrb[22].mxu0 %v3035_v14 }
0x1532   :  { %v3799_v16 = vpop.f32.mrb[22].mxu0 }
0x1533   :  { %v3133_v26 = vadd.f32 %v3799_v16, %v3299_v15  ;;  %v3127_v25 = vpop.f32.mrb[23].mxu0 }
0x1534   :  { %v3128_v17 = vadd.f32 %v3299_v15, %v3127_v25 }
0x1535   :  { %v3137_v18 = vadd.f32 %v3133_v26, %v2931_v49 }
0x1536   :  { %v3136_v19 = vadd.f32 %v3128_v17, %v2930_v48 }
0x1537   :  { %3139 = vst.msk [vmem:[#allocation2 + $0x8] sm:$0xff] %vm40_vm0, %v3137_v18 }
0x1538   :  { %3138 = vst.msk [vmem:[#allocation2] sm:$0xff] %vm40_vm0, %v3136_v19 }
0x1539   :  { %4060 = shalt.err (!%p4057_p4)
}
0x153a   :  { %s4061_s24 = scalar_lea.hbm %s4679_s8, 256 }
0x153b   :  { %p4062_p5 = scmp.ne.s32.totalorder %s4679_s8, %s4061_s24  ;;  %p4065_p6 = scmp.lt.u32.totalorder %s4061_s24, %s4679_s8 }
0x153d   :  { %p4067_p7 = pnand %p4065_p6, %p4062_p5 }
0x153f   :  { %4070 = shalt.err (!%p4067_p7)
}
0x1540   :  { %s4076_s28 = smov 128   ;;  %s4077_s0 = smov 8  }
0x1541   :  { %3151 = dma.vmem_to_hbm [thread:$0]  %s3146_s21, 256, %s4679_s8, [#allocation3], %s4076_s28, %s4076_s28, %s4077_s0  }
0x1542   :  { %4071 = dma.done.wait [#allocation3], 256  }
0x1543   :  { %4072 = vsyncadd [#allocation3], 4294967040 }
0x1544   :  { %3155 = vsyncpa [#allocation3], 1 }

</bundles_post_ra>
